<compile_context>
chip_gen: v5e
topology: v5e:2x2
jax: 0.10.0
libtpu: 0.0.40
codegen_flags: <defaults>
</compile_context>

<pallas_src>
import functools
import numpy as np

import jax
import jax.numpy as jnp
from jax import lax
from jax.experimental import pallas as pl
from jax.experimental.pallas import tpu as pltpu


# ----------------------------------------------------------------------------
# Generation-aware compiler params
# ----------------------------------------------------------------------------

@functools.lru_cache(maxsize=None)
def _vmem_limit_bytes():
    cap = None
    try:
        info = pltpu.get_tpu_info()
        for name in ("vmem_capacity_bytes", "vmem_size_bytes", "vmem_bytes"):
            v = getattr(info, name, None)
            if v is not None:
                cap = int(v)
                break
    except Exception:
        cap = None
    if cap is None or cap <= 0:
        return 64 * 1024 * 1024                      # safe fallback (ran clean before)
    # 3/4 of physical VMEM: ~48 MiB on v7x (64 MiB), ~96 MiB on v5e/v6e (128 MiB).
    return max(48 * 1024 * 1024, min((cap * 3) // 4, 112 * 1024 * 1024))


def _compiler_params(dims):
    return pltpu.CompilerParams(dimension_semantics=dims,
                                vmem_limit_bytes=_vmem_limit_bytes())


def _round_up(x, m):
    return ((x + m - 1) // m) * m


# ----------------------------------------------------------------------------
# Tiled projection matmul (f32 accumulate, bf16 or f32 inputs)
# ----------------------------------------------------------------------------

def _matmul_kernel_single_k(x_ref, w_ref, o_ref):
    # K fits in one step: no accumulator, no init/finalize.
    o_ref[...] = jnp.dot(x_ref[...], w_ref[...],
                         preferred_element_type=jnp.float32).astype(o_ref.dtype)


def _matmul_kernel_acc(x_ref, w_ref, o_ref, acc_ref):
    @pl.when(pl.program_id(2) == 0)
    def _init():
        acc_ref[...] = jnp.zeros_like(acc_ref)

    acc_ref[...] += jnp.dot(x_ref[...], w_ref[...],
                            preferred_element_type=jnp.float32)

    @pl.when(pl.program_id(2) == pl.num_programs(2) - 1)
    def _store():
        o_ref[...] = acc_ref[...].astype(o_ref.dtype)


def pallas_matmul(x, w, out_dtype=None, tm_max=512, tn_max=512, tk_max=1024):
    """y = x @ w with (8/16,128)-aligned tiles; zero-pads to exact-division grids."""
    M, Kd = x.shape
    Kd2, N = w.shape
    assert Kd == Kd2
    out_dtype = out_dtype if out_dtype is not None else x.dtype

    sub = 16 if x.dtype == jnp.bfloat16 else 8
    tm = min(_round_up(M, sub), tm_max)              # multiple of 8/16 (or full M rounded)
    tn = min(_round_up(N, 128), tn_max)              # multiple of 128 lanes
    tk = Kd if Kd <= tk_max else 512                 # single K step when it fits

    Mp, Np, Kp = _round_up(M, tm), _round_up(N, tn), _round_up(Kd, tk)
    xp = x if (Mp == M and Kp == Kd) else jnp.pad(x, ((0, Mp - M), (0, Kp - Kd)))
    wp = w if (Kp == Kd and Np == N) else jnp.pad(w, ((0, Kp - Kd), (0, Np - N)))

    if Kp == tk:
        out = pl.pallas_call(
            _matmul_kernel_single_k,
            out_shape=jax.ShapeDtypeStruct((Mp, Np), out_dtype),
            grid_spec=pltpu.PrefetchScalarGridSpec(
                num_scalar_prefetch=0,
                grid=(Mp // tm, Np // tn),
                in_specs=[pl.BlockSpec((tm, tk), lambda i, j: (i, 0)),
                          pl.BlockSpec((tk, tn), lambda i, j: (0, j))],
                out_specs=pl.BlockSpec((tm, tn), lambda i, j: (i, j))),
            compiler_params=_compiler_params(("parallel", "parallel")),
        )(xp, wp)
    else:
        out = pl.pallas_call(
            _matmul_kernel_acc,
            out_shape=jax.ShapeDtypeStruct((Mp, Np), out_dtype),
            grid_spec=pltpu.PrefetchScalarGridSpec(
                num_scalar_prefetch=0,
                grid=(Mp // tm, Np // tn, Kp // tk),
                in_specs=[pl.BlockSpec((tm, tk), lambda i, j, k: (i, k)),
                          pl.BlockSpec((tk, tn), lambda i, j, k: (k, j))],
                out_specs=pl.BlockSpec((tm, tn), lambda i, j, k: (i, j)),
                scratch_shapes=[pltpu.VMEM((tm, tn), jnp.float32)]),
            compiler_params=_compiler_params(("parallel", "parallel", "arbitrary")),
        )(xp, wp)

    if Mp != M or Np != N:
        out = out[:M, :N]
    return out


# ----------------------------------------------------------------------------
# Exact Transformer-XL rel_shift (in-kernel helpers)
# result[i, j] = cat_i[j + (T - 1 - i)],  cat_i = [bd0[i, :], 0, bd0[i+1, :]]
# ----------------------------------------------------------------------------

def _build_rel_cat(bd0):
    T, K = bd0.shape
    if T > 1:
        nxt = jnp.concatenate([bd0[1:], jnp.zeros((1, K), bd0.dtype)], axis=0)
    else:
        nxt = jnp.zeros((1, K), bd0.dtype)
    return jnp.concatenate([bd0, jnp.zeros((T, 1), bd0.dtype), nxt], axis=1)  # [T, 2K+1]


def _rel_shift_select(bd0):
    """O(log T) per-row shift built from static slices + selects (always lowers)."""
    # TODO(synk): when this fallback triggers it runs per head; a head-batched
    # [Hg, T, 2K+1] version would amortize the log(T) passes.
    T, K = bd0.shape
    if T == 1:
        return bd0
    cur = _build_rel_cat(bd0)
    row = lax.broadcasted_iota(jnp.int32, (T, 1), 0)
    shift = (T - 1) - row
    for bit in range((T - 1).bit_length()):
        s = 1 << bit
        shifted = jnp.concatenate([cur[:, s:], jnp.zeros((T, s), cur.dtype)], axis=1)
        cur = jnp.where(((shift >> bit) & 1) == 1, shifted, cur)
    return cur[:, :K]


def _rel_shift_roll(bd0, mode):
    """Single-pass per-row rotation on the XLU via pltpu.roll with a stride."""
    T, K = bd0.shape
    if T == 1:
        return bd0
    cat = _build_rel_cat(bd0)
    n = 2 * K + 1
    if mode == "roll_a":
        y = jnp.roll(cat, -(T - 1), axis=1)
        y = pltpu.roll(y, 0, 1, stride=1, stride_axis=0)
    elif mode == "roll_c":
        y = pltpu.roll(cat, n - (T - 1), 1, stride=1, stride_axis=0)
    else:  # "roll_b"
        y = pltpu.roll(cat, T - 1, 1, stride=-1, stride_axis=0)
    return y[:, :K]


def _rel_shift(bd0, mode):
    if mode in ("roll_a", "roll_b", "roll_c"):
        return _rel_shift_roll(bd0, mode)
    return _rel_shift_select(bd0)


def _rel_shift_numpy(x):
    """Reference semantics of torch's _rel_shift on a [T, K] slice."""
    T, K = x.shape
    pad = np.zeros((T, 1), x.dtype)
    flat = np.concatenate([pad, x], axis=1).reshape(-1)
    return flat[T:].reshape(T, K)


def select_rel_shift_mode(T, K):
    """Probe the TPU at the *actual* (T, K): use the XLU strided-rotate rel_shift
    iff it lowers and exactly matches Transformer-XL semantics; else fall back."""
    if T <= 1:
        return "select"
    x_np = (np.arange(T * K, dtype=np.float32) + 1.0).reshape(T, K)
    expect = _rel_shift_numpy(x_np)
    xj = jnp.asarray(x_np)
    for mode in ("roll_a", "roll_c", "roll_b"):
        try:
            def _probe_kernel(x_ref, o_ref, mode=mode):
                o_ref[...] = _rel_shift_roll(x_ref[...], mode)
            got = pl.pallas_call(
                _probe_kernel,
                out_shape=jax.ShapeDtypeStruct((T, K), jnp.float32),
            )(xj)
            got = np.asarray(jax.block_until_ready(got))
            if np.array_equal(got, expect):
                return mode
        except Exception:
            continue
    return "select"


# ----------------------------------------------------------------------------
# Fused relative-position attention kernel (head-major layout, head loop)
# ----------------------------------------------------------------------------

def _rel_attn_kernel(lens_ref, amask_ref, q_ref, k_ref, v_ref, r_ref,
                     rw_ref, rr_ref, o_ref, head_out, *, scale, shift_mode):
    Hg, T, D = q_ref.shape            # heads in this block, query len, head dim
    K = k_ref.shape[1]

    b = pl.program_id(0)
    # Additive length-mask bias built ONCE per grid step from SMEM scalars.
    col = lax.broadcasted_iota(jnp.int32, (1, K), 1)
    masked = jnp.logical_and(col >= lens_ref[b], amask_ref[0] != 0)
    mask_bias = jnp.where(masked, jnp.float32(-10000.0), jnp.float32(0.0))   # [1, K]

    cdt = q_ref.dtype
    approx = np.dtype(cdt) == np.dtype(jnp.bfloat16)
    dn = (((1,), (1,)), ((), ()))     # contract last dims: A @ B^T

    @pl.loop(0, Hg)
    def _per_head(h):                 # leading-axis head slicing: no lane relayouts
        q_h = q_ref[h]                # [T, D]
        k_h = k_ref[h]                # [K, D]
        v_h = v_ref[h]                # [K, D]
        r_h = r_ref[h]                # [K, D]
        q_rw = q_h + rw_ref[h]        # [T, D] (+ [1, D] broadcast)
        q_rr = q_h + rr_ref[h]

        ac = lax.dot_general(q_rw, k_h, dn, preferred_element_type=jnp.float32)   # [T, K]
        bd0 = lax.dot_general(q_rr, r_h, dn, preferred_element_type=jnp.float32)  # [T, K]
        bd = _rel_shift(bd0, shift_mode)

        score = (ac + bd) * scale + mask_bias
        m = jnp.max(score, axis=-1, keepdims=True)
        e = jnp.exp(score - m)                                                    # [T, K]
        l = jnp.sum(e, axis=-1, keepdims=True)                                    # [T, 1]
        pv = jnp.dot(e.astype(cdt), v_h, preferred_element_type=jnp.float32)      # [T, D]
        # dropout(p=0.0) after softmax is the identity -> omitted.
        head_out[h] = pv * pl.reciprocal(l, approx=approx)

    # Assemble one lane-dense [T, Hg*D] output slab (static lane slices only).
    for h in range(Hg):
        o_ref[:, h * D:(h + 1) * D] = head_out[h].astype(o_ref.dtype)


def pallas_rel_attention(lens_eff, apply_mask, q, k, v, r, rw, rr, *,
                         scale, shift_mode, head_groups):
    B, H, T, D = q.shape
    K = k.shape[2]
    G = head_groups
    Hg = H // G
    HD = H * D
    kernel = functools.partial(_rel_attn_kernel, scale=scale, shift_mode=shift_mode)
    return pl.pallas_call(
        kernel,
        out_shape=jax.ShapeDtypeStruct((B, T, HD), q.dtype),
        grid_spec=pltpu.PrefetchScalarGridSpec(
            num_scalar_prefetch=2,               # lens_eff, apply_mask -> SMEM
            grid=(B, G),
            in_specs=[
                pl.BlockSpec((None, Hg, T, D), lambda b, g, *_: (b, g, 0, 0)),
                pl.BlockSpec((None, Hg, K, D), lambda b, g, *_: (b, g, 0, 0)),
                pl.BlockSpec((None, Hg, K, D), lambda b, g, *_: (b, g, 0, 0)),
                pl.BlockSpec((Hg, K, D), lambda b, g, *_: (g, 0, 0)),
                pl.BlockSpec((Hg, 1, D), lambda b, g, *_: (g, 0, 0)),
                pl.BlockSpec((Hg, 1, D), lambda b, g, *_: (g, 0, 0)),
            ],
            out_specs=pl.BlockSpec((None, T, Hg * D), lambda b, g, *_: (b, 0, g)),
            scratch_shapes=[pltpu.VMEM((Hg, T, D), jnp.float32)],
        ),
        compiler_params=_compiler_params(("parallel", "parallel")),
    )(lens_eff, apply_mask, q, k, v, r, rw, rr)


# ----------------------------------------------------------------------------
# Glue (positional encoding, params, forward)
# ----------------------------------------------------------------------------

def sinusoid_pos_encoding(klen, demb):
    # TODO(synk): `self.pe` is injected externally in the original module; a
    # deterministic Transformer-XL sinusoidal encoding (positions K-1..0) is used.
    pos = jnp.arange(klen - 1, -1, -1, dtype=jnp.float32)
    inv_freq = 1.0 / (10000.0 ** (jnp.arange(0, demb, 2, dtype=jnp.float32) / demb))
    sinusoid = pos[:, None] * inv_freq[None, :]
    return jnp.concatenate([jnp.sin(sinusoid), jnp.cos(sinusoid)], axis=-1)   # [K, E]


def init_params(key, idim, n_head, d_head):
    E, H, D = idim, n_head, d_head
    k1, k2, k3, k4, k5 = jax.random.split(key, 5)

    def xavier(k, shape):
        fan_in, fan_out = shape[0], shape[-1]
        a = (6.0 / (fan_in + fan_out)) ** 0.5
        return jax.random.uniform(k, shape, jnp.float32, -a, a)

    # Linear layers stored as [in, out] (y = x @ W), matching torch's x @ W.T.
    return dict(
        w_qkv=xavier(k1, (E, 3 * H * D)),
        w_pos=xavier(k2, (E, H * D)),
        w_out=xavier(k3, (H * D, E)),
        r_w_bias=xavier(k4, (H, D)),
        r_r_bias=xavier(k5, (H, D)),
    )


def rel_pos_mha_forward(params, word_embedding, lens, n_head, d_head, mems=None,
                        compute_dtype=jnp.bfloat16, shift_mode="select"):
    """Jittable forward matching the PyTorch module (output [B, T, E] f32)."""
    B, T, E = word_embedding.shape
    H, D = n_head, d_head
    HD = H * D
    scale = 1.0 / float(D) ** 0.5

    if mems is not None:
        # TODO(synk): mems path (C > 0) is not exercised by the demo reference.
        C = mems.shape[1]
        emb = jnp.concatenate([mems, word_embedding], axis=1)     # [B, K, E]
    else:
        C = 0
        emb = word_embedding
    K = T + C

    # torch applies the length mask only when lens are not all equal; keep that
    # decision on-device (traced) so the forward stays jittable.
    lens_i32 = lens.astype(jnp.int32)
    apply_mask = jnp.any(lens_i32 != lens_i32[0]).astype(jnp.int32).reshape((1,))
    lens_eff = (lens_i32 + C).reshape((B,))

    pos_enc = sinusoid_pos_encoding(K, E)                         # [K, E]

    cdt = compute_dtype
    w_qkv = params['w_qkv'].astype(cdt)
    w_pos = params['w_pos'].astype(cdt)
    w_out = params['w_out'].astype(cdt)

    # Q projected only from the current segment (torch keeps W_head_q[-T:]);
    # K/V projected from the mem-concatenated embedding.
    q_flat = pallas_matmul(word_embedding.reshape(B * T, E).astype(cdt),
                           w_qkv[:, :HD], out_dtype=cdt)          # [B*T, HD]
    kv_flat = pallas_matmul(emb.reshape(B * K, E).astype(cdt),
                            w_qkv[:, HD:], out_dtype=cdt)         # [B*K, 2*HD]
    r_flat = pallas_matmul(pos_enc.astype(cdt), w_pos, out_dtype=cdt)   # [K, HD]

    # Head-major layout ("once-reshaped"): leading-axis head slicing in-kernel.
    q = q_flat.reshape(B, T, H, D).transpose(0, 2, 1, 3)          # [B, H, T, D]
    kv = kv_flat.reshape(B, K, 2, H, D).transpose(2, 0, 3, 1, 4)  # [2, B, H, K, D]
    k, v = kv[0], kv[1]
    r = r_flat.reshape(K, H, D).transpose(1, 0, 2)                # [H, K, D]

    rw = params['r_w_bias'].reshape(H, 1, D).astype(cdt)
    rr = params['r_r_bias'].reshape(H, 1, D).astype(cdt)

    # Second "parallel" grid axis (head groups) for v7x's two TensorCores, only
    # when it keeps the per-group output slab a multiple of 128 lanes.
    G = 2 if (H % 2 == 0 and ((H // 2) * D) % 128 == 0) else 1

    attn_vec = pallas_rel_attention(lens_eff, apply_mask, q, k, v, r, rw, rr,
                                    scale=scale, shift_mode=shift_mode,
                                    head_groups=G)                # [B, T, HD]

    out = pallas_matmul(attn_vec.reshape(B * T, HD), w_out, out_dtype=jnp.float32)
    return out.reshape(B, T, E)                                   # [B, T, E]


# ----------------------------------------------------------------------------
# Pure-JAX reference (mirrors the PyTorch forward, for validation; mems=None)
# ----------------------------------------------------------------------------

def _rel_shift_ref(x):                                  # x: [T, K, B, H]
    T, K, B, H = x.shape
    zero_pad = jnp.zeros((T, 1, B, H), x.dtype)
    x_padded = jnp.concatenate([zero_pad, x], axis=1)
    x_padded = x_padded.reshape(K + 1, T, B, H)
    return x_padded[1:].reshape(T, K, B, H)


def reference_forward(params, word_embedding, lens, n_head, d_head):
    B, T, E = word_embedding.shape
    H, D = n_head, d_head
    scale = 1.0 / float(D) ** 0.5
    P = lax.Precision.HIGHEST

    x = jnp.transpose(word_embedding, (1, 0, 2))        # [T, B, E]
    K = T
    lens_np = np.asarray(jax.device_get(lens)).astype(np.int64)
    attn_mask = None
    if not np.all(lens_np == lens_np[0]):
        attn_mask = jnp.asarray(np.arange(K)[:, None] >= lens_np[None, :])  # [K, B]

    pos_enc = sinusoid_pos_encoding(K, E)
    w_heads = jnp.einsum('tbe,ef->tbf', x, params['w_qkv'], precision=P)
    r_head_k = jnp.einsum('ke,ef->kf', pos_enc, params['w_pos'], precision=P)
    w_q, w_k, w_v = jnp.split(w_heads, 3, axis=-1)
    w_q = w_q.reshape(T, B, H, D)
    w_k = w_k.reshape(K, B, H, D)
    w_v = w_v.reshape(K, B, H, D)
    r = r_head_k.reshape(K, H, D)

    rw_q = w_q + params['r_w_bias']
    rr_q = w_q + params['r_r_bias']
    AC = jnp.einsum('ibnd,jbnd->ijbn', rw_q, w_k, precision=P)
    BD = jnp.einsum('ibnd,jnd->ijbn', rr_q, r, precision=P)
    BD = _rel_shift_ref(BD)
    score = (AC + BD) * scale
    if attn_mask is not None:
        score = jnp.where(attn_mask[None, :, :, None], -10000.0, score)
    prob = jax.nn.softmax(score, axis=1)
    vec = jnp.einsum('ijbn,jbnd->ibnd', prob, w_v, precision=P)
    vec = vec.reshape(T, B, H * D)
    out = jnp.einsum('tbf,fe->tbe', vec, params['w_out'], precision=P)
    return jnp.transpose(out, (1, 0, 2))


# ----------------------------------------------------------------------------
# Demo
# ----------------------------------------------------------------------------

if __name__ == "__main__":
    B, T, E, H, D = 2, 8, 64, 4, 64           # HD=256; (H/2)*D=128 -> exercises head groups
    key = jax.random.PRNGKey(0)
    kp, kx = jax.random.split(key)
    params = init_params(kp, E, H, D)
    word_embedding = jax.random.normal(kx, (B, T, E), jnp.float32)
    lens = jnp.array([8, 5], dtype=jnp.int32)   # unequal -> exercises masking

    # Probe at the ACTUAL (T, K) (mems=None -> K == T): use the XLU roll-based
    # rel_shift iff it lowers and is exact on this build; else select fallback.
    shift_mode = select_rel_shift_mode(T, T)

    fwd = jax.jit(rel_pos_mha_forward,
                  static_argnames=("n_head", "d_head", "compute_dtype", "shift_mode"))

    # f32 path: validates the exact algorithm against the high-precision reference.
    out = jax.block_until_ready(
        fwd(params, word_embedding, lens, n_head=H, d_head=D,
            compute_dtype=jnp.float32, shift_mode=shift_mode))
    assert out.shape == (B, T, E)

    ref = jax.block_until_ready(reference_forward(params, word_embedding, lens, H, D))
    np.testing.assert_allclose(np.asarray(out), np.asarray(ref),
                               rtol=5e-3, atol=5e-3)

    # bf16 MXU path (f32 accumulation) -- the default/fast production configuration.
    out_bf16 = jax.block_until_ready(
        fwd(params, word_embedding, lens, n_head=H, d_head=D,
            compute_dtype=jnp.bfloat16, shift_mode=shift_mode))
    np.testing.assert_allclose(np.asarray(out_bf16), np.asarray(ref),
                               rtol=1e-1, atol=1e-1)

    print("KERNEL_OK")
</pallas_src>

<mosaic_0001>
module attributes {stable_mosaic.version = 11 : i64} {
  func.func @_probe_kernel(%arg0: memref<8x8xf32, #tpu.memory_space<vmem>>, %arg1: memref<8x8xf32, #tpu.memory_space<vmem>>) attributes {dimension_semantics = [], scalar_prefetch = 0 : i64, scratch_operands = 0 : i64, tpu.core_type = #tpu.core_type<tc>} {
    %c0 = arith.constant 0 : index
    %c0_0 = arith.constant 0 : index
    %0 = vector.load %arg0[%c0, %c0_0] : memref<8x8xf32, #tpu.memory_space<vmem>>, vector<8x8xf32>
    %1 = vector.extract_strided_slice %0 {offsets = [1, 0], sizes = [7, 8], strides = [1, 1]} : vector<8x8xf32> to vector<7x8xf32>
    %cst = arith.constant 0.000000e+00 : f32
    %2 = vector.broadcast %cst : f32 to vector<1x8xf32>
    %3 = tpu.concatenate %1, %2 in 0 : vector<7x8xf32>, vector<1x8xf32> -> vector<8x8xf32>
    %cst_1 = arith.constant 0.000000e+00 : f32
    %4 = vector.broadcast %cst_1 : f32 to vector<8x1xf32>
    %5 = tpu.concatenate %0, %4, %3 in 1 : vector<8x8xf32>, vector<8x1xf32>, vector<8x8xf32> -> vector<8x17xf32>
    %6 = vector.extract_strided_slice %5 {offsets = [0, 7], sizes = [8, 10], strides = [1, 1]} : vector<8x17xf32> to vector<8x10xf32>
    %7 = vector.extract_strided_slice %5 {offsets = [0, 0], sizes = [8, 7], strides = [1, 1]} : vector<8x17xf32> to vector<8x7xf32>
    %8 = tpu.concatenate %6, %7 in 1 : vector<8x10xf32>, vector<8x7xf32> -> vector<8x17xf32>
    %c0_i32 = arith.constant 0 : i32
    %9 = tpu.dynamic_rotate %8 by %c0_i32 dim 1 {stride = 1 : si32, stride_dimension = 0 : si32} : vector<8x17xf32>, i32 -> vector<8x17xf32>
    %10 = vector.extract_strided_slice %9 {offsets = [0, 0], sizes = [8, 8], strides = [1, 1]} : vector<8x17xf32> to vector<8x8xf32>
    %c0_2 = arith.constant 0 : index
    %c0_3 = arith.constant 0 : index
    %11 = vector.load %arg1[%c0_2, %c0_3] : memref<8x8xf32, #tpu.memory_space<vmem>>, vector<8x8xf32>
    tpu.vector_store %arg1[%c0_2, %c0_3], %10 {strides = array<i32>} : memref<8x8xf32, #tpu.memory_space<vmem>>, vector<8x8xf32>,
    return
  }
}

module attributes {stable_mosaic.version = 11 : i64} {
  func.func @_probe_kernel(%arg0: memref<8x8xf32, #tpu.memory_space<vmem>>, %arg1: memref<8x8xf32, #tpu.memory_space<vmem>>) attributes {dimension_semantics = [], scalar_prefetch = 0 : i64, scratch_operands = 0 : i64, tpu.core_type = #tpu.core_type<tc>} {
    %c0 = arith.constant 0 : index
    %c0_0 = arith.constant 0 : index
    %0 = vector.load %arg0[%c0, %c0_0] : memref<8x8xf32, #tpu.memory_space<vmem>>, vector<8x8xf32>
    %1 = vector.extract_strided_slice %0 {offsets = [1, 0], sizes = [7, 8], strides = [1, 1]} : vector<8x8xf32> to vector<7x8xf32>
    %cst = arith.constant 0.000000e+00 : f32
    %2 = vector.broadcast %cst : f32 to vector<1x8xf32>
    %3 = tpu.concatenate %1, %2 in 0 : vector<7x8xf32>, vector<1x8xf32> -> vector<8x8xf32>
    %cst_1 = arith.constant 0.000000e+00 : f32
    %4 = vector.broadcast %cst_1 : f32 to vector<8x1xf32>
    %5 = tpu.concatenate %0, %4, %3 in 1 : vector<8x8xf32>, vector<8x1xf32>, vector<8x8xf32> -> vector<8x17xf32>
    %c10_i32 = arith.constant 10 : i32
    %6 = tpu.dynamic_rotate %5 by %c10_i32 dim 1 {stride = 1 : si32, stride_dimension = 0 : si32} : vector<8x17xf32>, i32 -> vector<8x17xf32>
    %7 = vector.extract_strided_slice %6 {offsets = [0, 0], sizes = [8, 8], strides = [1, 1]} : vector<8x17xf32> to vector<8x8xf32>
    %c0_2 = arith.constant 0 : index
    %c0_3 = arith.constant 0 : index
    %8 = vector.load %arg1[%c0_2, %c0_3] : memref<8x8xf32, #tpu.memory_space<vmem>>, vector<8x8xf32>
    tpu.vector_store %arg1[%c0_2, %c0_3], %7 {strides = array<i32>} : memref<8x8xf32, #tpu.memory_space<vmem>>, vector<8x8xf32>,
    return
  }
}

module attributes {stable_mosaic.version = 11 : i64} {
  func.func @_matmul_kernel_single_k(%arg0: i32, %arg1: i32, %arg2: memref<16x64xf32, #tpu.memory_space<vmem>>, %arg3: memref<64x512xf32, #tpu.memory_space<vmem>>, %arg4: memref<16x512xf32, #tpu.memory_space<vmem>>) attributes {dimension_semantics = [#tpu.dimension_semantics<parallel>, #tpu.dimension_semantics<parallel>], iteration_bounds = array<i64: 1, 1>, scalar_prefetch = 0 : i64, scratch_operands = 0 : i64, tpu.core_type = #tpu.core_type<tc>, window_params = [{transform_indices = @transform_0, window_bounds = array<i64: 16, 64>}, {transform_indices = @transform_1, window_bounds = array<i64: 64, 512>}, {transform_indices = @transform_2, window_bounds = array<i64: 16, 512>}]} {
    %c0 = arith.constant 0 : index
    %c0_0 = arith.constant 0 : index
    %0 = vector.load %arg2[%c0, %c0_0] : memref<16x64xf32, #tpu.memory_space<vmem>>, vector<16x64xf32>
    %c0_1 = arith.constant 0 : index
    %c0_2 = arith.constant 0 : index
    %1 = vector.load %arg3[%c0_1, %c0_2] : memref<64x512xf32, #tpu.memory_space<vmem>>, vector<64x512xf32>
    %cst = arith.constant dense<0.000000e+00> : vector<16x512xf32>
    %2 = tpu.matmul %0, %1, %cst {dimension_numbers = #tpu.dot_dimension_numbers<[1], [0], [0], [1], [0, 0, 1, 1], [], []>} : vector<16x64xf32>, vector<64x512xf32>, vector<16x512xf32> -> vector<16x512xf32>
    %c0_3 = arith.constant 0 : index
    %c0_4 = arith.constant 0 : index
    %3 = vector.load %arg4[%c0_3, %c0_4] : memref<16x512xf32, #tpu.memory_space<vmem>>, vector<16x512xf32>
    tpu.vector_store %arg4[%c0_3, %c0_4], %2 {strides = array<i32>} : memref<16x512xf32, #tpu.memory_space<vmem>>, vector<16x512xf32>,
    return
  }
  func.func @transform_0(%arg0: i32, %arg1: i32) -> (i32, i32) {
    %c0_i32 = arith.constant 0 : i32
    %c0_i32_0 = arith.constant 0 : i32
    return %arg0, %c0_i32 : i32, i32
  }
  func.func @transform_1(%arg0: i32, %arg1: i32) -> (i32, i32) {
    %c0_i32 = arith.constant 0 : i32
    %c0_i32_0 = arith.constant 0 : i32
    return %c0_i32, %arg1 : i32, i32
  }
  func.func @transform_2(%arg0: i32, %arg1: i32) -> (i32, i32) {
    %c0_i32 = arith.constant 0 : i32
    return %arg0, %arg1 : i32, i32
  }
}

module attributes {stable_mosaic.version = 11 : i64} {
  func.func @_matmul_kernel_single_k(%arg0: i32, %arg1: i32, %arg2: memref<16x64xf32, #tpu.memory_space<vmem>>, %arg3: memref<64x256xf32, #tpu.memory_space<vmem>>, %arg4: memref<16x256xf32, #tpu.memory_space<vmem>>) attributes {dimension_semantics = [#tpu.dimension_semantics<parallel>, #tpu.dimension_semantics<parallel>], iteration_bounds = array<i64: 1, 1>, scalar_prefetch = 0 : i64, scratch_operands = 0 : i64, tpu.core_type = #tpu.core_type<tc>, window_params = [{transform_indices = @transform_0, window_bounds = array<i64: 16, 64>}, {transform_indices = @transform_1, window_bounds = array<i64: 64, 256>}, {transform_indices = @transform_2, window_bounds = array<i64: 16, 256>}]} {
    %c0 = arith.constant 0 : index
    %c0_0 = arith.constant 0 : index
    %0 = vector.load %arg2[%c0, %c0_0] : memref<16x64xf32, #tpu.memory_space<vmem>>, vector<16x64xf32>
    %c0_1 = arith.constant 0 : index
    %c0_2 = arith.constant 0 : index
    %1 = vector.load %arg3[%c0_1, %c0_2] : memref<64x256xf32, #tpu.memory_space<vmem>>, vector<64x256xf32>
    %cst = arith.constant dense<0.000000e+00> : vector<16x256xf32>
    %2 = tpu.matmul %0, %1, %cst {dimension_numbers = #tpu.dot_dimension_numbers<[1], [0], [0], [1], [0, 0, 1, 1], [], []>} : vector<16x64xf32>, vector<64x256xf32>, vector<16x256xf32> -> vector<16x256xf32>
    %c0_3 = arith.constant 0 : index
    %c0_4 = arith.constant 0 : index
    %3 = vector.load %arg4[%c0_3, %c0_4] : memref<16x256xf32, #tpu.memory_space<vmem>>, vector<16x256xf32>
    tpu.vector_store %arg4[%c0_3, %c0_4], %2 {strides = array<i32>} : memref<16x256xf32, #tpu.memory_space<vmem>>, vector<16x256xf32>,
    return
  }
  func.func @transform_0(%arg0: i32, %arg1: i32) -> (i32, i32) {
    %c0_i32 = arith.constant 0 : i32
    %c0_i32_0 = arith.constant 0 : i32
    return %arg0, %c0_i32 : i32, i32
  }
  func.func @transform_1(%arg0: i32, %arg1: i32) -> (i32, i32) {
    %c0_i32 = arith.constant 0 : i32
    %c0_i32_0 = arith.constant 0 : i32
    return %c0_i32, %arg1 : i32, i32
  }
  func.func @transform_2(%arg0: i32, %arg1: i32) -> (i32, i32) {
    %c0_i32 = arith.constant 0 : i32
    return %arg0, %arg1 : i32, i32
  }
}

module attributes {stable_mosaic.version = 11 : i64} {
  func.func @_matmul_kernel_single_k(%arg0: i32, %arg1: i32, %arg2: memref<8x64xf32, #tpu.memory_space<vmem>>, %arg3: memref<64x256xf32, #tpu.memory_space<vmem>>, %arg4: memref<8x256xf32, #tpu.memory_space<vmem>>) attributes {dimension_semantics = [#tpu.dimension_semantics<parallel>, #tpu.dimension_semantics<parallel>], iteration_bounds = array<i64: 1, 1>, scalar_prefetch = 0 : i64, scratch_operands = 0 : i64, tpu.core_type = #tpu.core_type<tc>, window_params = [{transform_indices = @transform_0, window_bounds = array<i64: 8, 64>}, {transform_indices = @transform_1, window_bounds = array<i64: 64, 256>}, {transform_indices = @transform_2, window_bounds = array<i64: 8, 256>}]} {
    %c0 = arith.constant 0 : index
    %c0_0 = arith.constant 0 : index
    %0 = vector.load %arg2[%c0, %c0_0] : memref<8x64xf32, #tpu.memory_space<vmem>>, vector<8x64xf32>
    %c0_1 = arith.constant 0 : index
    %c0_2 = arith.constant 0 : index
    %1 = vector.load %arg3[%c0_1, %c0_2] : memref<64x256xf32, #tpu.memory_space<vmem>>, vector<64x256xf32>
    %cst = arith.constant dense<0.000000e+00> : vector<8x256xf32>
    %2 = tpu.matmul %0, %1, %cst {dimension_numbers = #tpu.dot_dimension_numbers<[1], [0], [0], [1], [0, 0, 1, 1], [], []>} : vector<8x64xf32>, vector<64x256xf32>, vector<8x256xf32> -> vector<8x256xf32>
    %c0_3 = arith.constant 0 : index
    %c0_4 = arith.constant 0 : index
    %3 = vector.load %arg4[%c0_3, %c0_4] : memref<8x256xf32, #tpu.memory_space<vmem>>, vector<8x256xf32>
    tpu.vector_store %arg4[%c0_3, %c0_4], %2 {strides = array<i32>} : memref<8x256xf32, #tpu.memory_space<vmem>>, vector<8x256xf32>,
    return
  }
  func.func @transform_0(%arg0: i32, %arg1: i32) -> (i32, i32) {
    %c0_i32 = arith.constant 0 : i32
    %c0_i32_0 = arith.constant 0 : i32
    return %arg0, %c0_i32 : i32, i32
  }
  func.func @transform_1(%arg0: i32, %arg1: i32) -> (i32, i32) {
    %c0_i32 = arith.constant 0 : i32
    %c0_i32_0 = arith.constant 0 : i32
    return %c0_i32, %arg1 : i32, i32
  }
  func.func @transform_2(%arg0: i32, %arg1: i32) -> (i32, i32) {
    %c0_i32 = arith.constant 0 : i32
    return %arg0, %arg1 : i32, i32
  }
}

module attributes {stable_mosaic.version = 11 : i64} {
  func.func @_rel_attn_kernel(%arg0: i32, %arg1: i32, %arg2: memref<2xi32, #tpu.memory_space<smem>>, %arg3: memref<1xi32, #tpu.memory_space<smem>>, %arg4: memref<1x2x8x64xf32, #tpu.memory_space<vmem>>, %arg5: memref<1x2x8x64xf32, #tpu.memory_space<vmem>>, %arg6: memref<1x2x8x64xf32, #tpu.memory_space<vmem>>, %arg7: memref<2x8x64xf32, #tpu.memory_space<vmem>>, %arg8: memref<2x1x64xf32, #tpu.memory_space<vmem>>, %arg9: memref<2x1x64xf32, #tpu.memory_space<vmem>>, %arg10: memref<1x8x128xf32, #tpu.memory_space<vmem>>, %arg11: memref<2x8x64xf32, #tpu.memory_space<vmem>>) attributes {dimension_semantics = [#tpu.dimension_semantics<parallel>, #tpu.dimension_semantics<parallel>], iteration_bounds = array<i64: 2, 2>, scalar_prefetch = 2 : i64, scratch_operands = 1 : i64, tpu.core_type = #tpu.core_type<tc>, window_params = [{transform_indices = @transform_0, window_bounds = array<i64: 1, 2, 8, 64>}, {transform_indices = @transform_1, window_bounds = array<i64: 1, 2, 8, 64>}, {transform_indices = @transform_2, window_bounds = array<i64: 1, 2, 8, 64>}, {transform_indices = @transform_3, window_bounds = array<i64: 2, 8, 64>}, {transform_indices = @transform_4, window_bounds = array<i64: 2, 1, 64>}, {transform_indices = @transform_5, window_bounds = array<i64: 2, 1, 64>}, {transform_indices = @transform_6, window_bounds = array<i64: 1, 8, 128>}]} {
    %0 = tpu.iota {dimensions = array<i32: 1>} : vector<1x8xi32>
    %1 = arith.index_cast %arg0 : i32 to index
    %2 = memref.load %arg2[%1] : memref<2xi32, #tpu.memory_space<smem>>
    %3 = vector.broadcast %2 : i32 to vector<1x8xi32>
    %4 = arith.cmpi sge, %0, %3 : vector<1x8xi32>
    %c0 = arith.constant 0 : index
    %5 = memref.load %arg3[%c0] : memref<1xi32, #tpu.memory_space<smem>>
    %c0_i32 = arith.constant 0 : i32
    %6 = arith.cmpi ne, %5, %c0_i32 : i32
    %7 = vector.broadcast %6 : i1 to vector<1x8xi1>
    %8 = arith.andi %4, %7 : vector<1x8xi1>
    %cst = arith.constant -1.000000e+04 : f32
    %cst_0 = arith.constant 0.000000e+00 : f32
    %9 = vector.broadcast %cst : f32 to vector<1x8xf32>
    %10 = vector.broadcast %cst_0 : f32 to vector<1x8xf32>
    %11 = arith.select %8, %9, %10 : vector<1x8xi1>, vector<1x8xf32>
    %c0_i32_1 = arith.constant 0 : i32
    %c2_i32 = arith.constant 2 : i32
    %12 = arith.addi %c0_i32_1, %c2_i32 : i32
    %c1_i32 = arith.constant 1 : i32
    scf.for %arg12 = %c0_i32_1 to %12 step %c1_i32  : i32 {
      %c1_i32_13 = arith.constant 1 : i32
      %23 = arith.muli %arg12, %c1_i32_13 : i32
      %c0_i32_14 = arith.constant 0 : i32
      %24 = arith.addi %c0_i32_14, %23 : i32
      %c0_15 = arith.constant 0 : index
      %25 = arith.index_cast %24 : i32 to index
      %c0_16 = arith.constant 0 : index
      %c0_17 = arith.constant 0 : index
      %26 = vector.load %arg4[%c0_15, %25, %c0_16, %c0_17] : memref<1x2x8x64xf32, #tpu.memory_space<vmem>>, vector<1x1x8x64xf32>
      %27 = vector.shape_cast %26 : vector<1x1x8x64xf32> to vector<8x64xf32>
      %c0_18 = arith.constant 0 : index
      %28 = arith.index_cast %24 : i32 to index
      %c0_19 = arith.constant 0 : index
      %c0_20 = arith.constant 0 : index
      %29 = vector.load %arg5[%c0_18, %28, %c0_19, %c0_20] : memref<1x2x8x64xf32, #tpu.memory_space<vmem>>, vector<1x1x8x64xf32>
      %30 = vector.shape_cast %29 : vector<1x1x8x64xf32> to vector<8x64xf32>
      %c0_21 = arith.constant 0 : index
      %31 = arith.index_cast %24 : i32 to index
      %c0_22 = arith.constant 0 : index
      %c0_23 = arith.constant 0 : index
      %32 = vector.load %arg6[%c0_21, %31, %c0_22, %c0_23] : memref<1x2x8x64xf32, #tpu.memory_space<vmem>>, vector<1x1x8x64xf32>
      %33 = vector.shape_cast %32 : vector<1x1x8x64xf32> to vector<8x64xf32>
      %34 = arith.index_cast %24 : i32 to index
      %c0_24 = arith.constant 0 : index
      %c0_25 = arith.constant 0 : index
      %35 = vector.load %arg7[%34, %c0_24, %c0_25] : memref<2x8x64xf32, #tpu.memory_space<vmem>>, vector<1x8x64xf32>
      %36 = vector.shape_cast %35 : vector<1x8x64xf32> to vector<8x64xf32>
      %37 = arith.index_cast %24 : i32 to index
      %c0_26 = arith.constant 0 : index
      %c0_27 = arith.constant 0 : index
      %38 = vector.load %arg8[%37, %c0_26, %c0_27] : memref<2x1x64xf32, #tpu.memory_space<vmem>>, vector<1x1x64xf32>
      %39 = vector.shape_cast %38 : vector<1x1x64xf32> to vector<1x64xf32>
      %40 = vector.broadcast %39 : vector<1x64xf32> to vector<8x64xf32>
      %41 = arith.addf %27, %40 : vector<8x64xf32>
      %42 = arith.index_cast %24 : i32 to index
      %c0_28 = arith.constant 0 : index
      %c0_29 = arith.constant 0 : index
      %43 = vector.load %arg9[%42, %c0_28, %c0_29] : memref<2x1x64xf32, #tpu.memory_space<vmem>>, vector<1x1x64xf32>
      %44 = vector.shape_cast %43 : vector<1x1x64xf32> to vector<1x64xf32>
      %45 = vector.broadcast %44 : vector<1x64xf32> to vector<8x64xf32>
      %46 = arith.addf %27, %45 : vector<8x64xf32>
      %cst_30 = arith.constant dense<0.000000e+00> : vector<8x8xf32>
      %47 = tpu.matmul %41, %30, %cst_30 {dimension_numbers = #tpu.dot_dimension_numbers<[1], [1], [0], [0], [0, 0, 1, 0], [], []>} : vector<8x64xf32>, vector<8x64xf32>, vector<8x8xf32> -> vector<8x8xf32>
      %cst_31 = arith.constant dense<0.000000e+00> : vector<8x8xf32>
      %48 = tpu.matmul %46, %36, %cst_31 {dimension_numbers = #tpu.dot_dimension_numbers<[1], [1], [0], [0], [0, 0, 1, 0], [], []>} : vector<8x64xf32>, vector<8x64xf32>, vector<8x8xf32> -> vector<8x8xf32>
      %49 = vector.extract_strided_slice %48 {offsets = [1, 0], sizes = [7, 8], strides = [1, 1]} : vector<8x8xf32> to vector<7x8xf32>
      %cst_32 = arith.constant 0.000000e+00 : f32
      %50 = vector.broadcast %cst_32 : f32 to vector<1x8xf32>
      %51 = tpu.concatenate %49, %50 in 0 : vector<7x8xf32>, vector<1x8xf32> -> vector<8x8xf32>
      %cst_33 = arith.constant 0.000000e+00 : f32
      %52 = vector.broadcast %cst_33 : f32 to vector<8x1xf32>
      %53 = tpu.concatenate %48, %52, %51 in 1 : vector<8x8xf32>, vector<8x1xf32>, vector<8x8xf32> -> vector<8x17xf32>
      %54 = tpu.iota {dimensions = array<i32: 0>} : vector<8x1xi32>
      %c7_i32 = arith.constant 7 : i32
      %55 = vector.broadcast %c7_i32 : i32 to vector<8x1xi32>
      %56 = arith.subi %55, %54 : vector<8x1xi32>
      %57 = vector.extract_strided_slice %53 {offsets = [0, 1], sizes = [8, 16], strides = [1, 1]} : vector<8x17xf32> to vector<8x16xf32>
      %cst_34 = arith.constant 0.000000e+00 : f32
      %58 = vector.broadcast %cst_34 : f32 to vector<8x1xf32>
      %59 = tpu.concatenate %57, %58 in 1 : vector<8x16xf32>, vector<8x1xf32> -> vector<8x17xf32>
      %c0_i32_35 = arith.constant 0 : i32
      %60 = vector.broadcast %c0_i32_35 : i32 to vector<8x1xi32>
      %61 = arith.shrsi %56, %60 : vector<8x1xi32>
      %c1_i32_36 = arith.constant 1 : i32
      %62 = vector.broadcast %c1_i32_36 : i32 to vector<8x1xi32>
      %63 = arith.andi %61, %62 : vector<8x1xi32>
      %c1_i32_37 = arith.constant 1 : i32
      %64 = vector.broadcast %c1_i32_37 : i32 to vector<8x1xi32>
      %65 = arith.cmpi eq, %63, %64 : vector<8x1xi32>
      %66 = vector.shape_cast %65 : vector<8x1xi1> to vector<8x1xi1>
      %67 = vector.broadcast %66 : vector<8x1xi1> to vector<8x17xi1>
      %68 = arith.select %67, %59, %53 : vector<8x17xi1>, vector<8x17xf32>
      %69 = vector.extract_strided_slice %68 {offsets = [0, 2], sizes = [8, 15], strides = [1, 1]} : vector<8x17xf32> to vector<8x15xf32>
      %cst_38 = arith.constant 0.000000e+00 : f32
      %70 = vector.broadcast %cst_38 : f32 to vector<8x2xf32>
      %71 = tpu.concatenate %69, %70 in 1 : vector<8x15xf32>, vector<8x2xf32> -> vector<8x17xf32>
      %c1_i32_39 = arith.constant 1 : i32
      %72 = vector.broadcast %c1_i32_39 : i32 to vector<8x1xi32>
      %73 = arith.shrsi %56, %72 : vector<8x1xi32>
      %c1_i32_40 = arith.constant 1 : i32
      %74 = vector.broadcast %c1_i32_40 : i32 to vector<8x1xi32>
      %75 = arith.andi %73, %74 : vector<8x1xi32>
      %c1_i32_41 = arith.constant 1 : i32
      %76 = vector.broadcast %c1_i32_41 : i32 to vector<8x1xi32>
      %77 = arith.cmpi eq, %75, %76 : vector<8x1xi32>
      %78 = vector.shape_cast %77 : vector<8x1xi1> to vector<8x1xi1>
      %79 = vector.broadcast %78 : vector<8x1xi1> to vector<8x17xi1>
      %80 = arith.select %79, %71, %68 : vector<8x17xi1>, vector<8x17xf32>
      %81 = vector.extract_strided_slice %80 {offsets = [0, 4], sizes = [8, 13], strides = [1, 1]} : vector<8x17xf32> to vector<8x13xf32>
      %cst_42 = arith.constant 0.000000e+00 : f32
      %82 = vector.broadcast %cst_42 : f32 to vector<8x4xf32>
      %83 = tpu.concatenate %81, %82 in 1 : vector<8x13xf32>, vector<8x4xf32> -> vector<8x17xf32>
      %c2_i32_43 = arith.constant 2 : i32
      %84 = vector.broadcast %c2_i32_43 : i32 to vector<8x1xi32>
      %85 = arith.shrsi %56, %84 : vector<8x1xi32>
      %c1_i32_44 = arith.constant 1 : i32
      %86 = vector.broadcast %c1_i32_44 : i32 to vector<8x1xi32>
      %87 = arith.andi %85, %86 : vector<8x1xi32>
      %c1_i32_45 = arith.constant 1 : i32
      %88 = vector.broadcast %c1_i32_45 : i32 to vector<8x1xi32>
      %89 = arith.cmpi eq, %87, %88 : vector<8x1xi32>
      %90 = vector.shape_cast %89 : vector<8x1xi1> to vector<8x1xi1>
      %91 = vector.broadcast %90 : vector<8x1xi1> to vector<8x17xi1>
      %92 = arith.select %91, %83, %80 : vector<8x17xi1>, vector<8x17xf32>
      %93 = vector.extract_strided_slice %92 {offsets = [0, 0], sizes = [8, 8], strides = [1, 1]} : vector<8x17xf32> to vector<8x8xf32>
      %94 = arith.addf %47, %93 : vector<8x8xf32>
      %cst_46 = arith.constant 1.250000e-01 : f32
      %95 = vector.broadcast %cst_46 : f32 to vector<8x8xf32>
      %96 = arith.mulf %94, %95 : vector<8x8xf32>
      %97 = vector.broadcast %11 : vector<1x8xf32> to vector<8x8xf32>
      %98 = arith.addf %96, %97 : vector<8x8xf32>
      %cst_47 = arith.constant dense<0xFF800000> : vector<8xf32>
      %99 = vector.multi_reduction <maximumf>, %98, %cst_47 [1] : vector<8x8xf32> to vector<8xf32>
      %100 = vector.shape_cast %99 : vector<8xf32> to vector<8x1xf32>
      %101 = vector.broadcast %100 : vector<8x1xf32> to vector<8x8xf32>
      %102 = arith.subf %98, %101 : vector<8x8xf32>
      %103 = math.exp %102 : vector<8x8xf32>
      %cst_48 = arith.constant dense<0.000000e+00> : vector<8xf32>
      %104 = vector.multi_reduction <add>, %103, %cst_48 [1] : vector<8x8xf32> to vector<8xf32>
      %105 = vector.shape_cast %104 : vector<8xf32> to vector<8x1xf32>
      %cst_49 = arith.constant dense<0.000000e+00> : vector<8x64xf32>
      %106 = tpu.matmul %103, %33, %cst_49 {dimension_numbers = #tpu.dot_dimension_numbers<[1], [0], [0], [1], [0, 0, 1, 1], [], []>} : vector<8x8xf32>, vector<8x64xf32>, vector<8x64xf32> -> vector<8x64xf32>
      %107 = tpu.reciprocal %105 : vector<8x1xf32> -> vector<8x1xf32>
      %108 = vector.broadcast %107 : vector<8x1xf32> to vector<8x64xf32>
      %109 = arith.mulf %106, %108 : vector<8x64xf32>
      %110 = arith.index_cast %24 : i32 to index
      %c0_50 = arith.constant 0 : index
      %c0_51 = arith.constant 0 : index
      %111 = vector.load %arg11[%110, %c0_50, %c0_51] : memref<2x8x64xf32, #tpu.memory_space<vmem>>, vector<1x8x64xf32>
      %112 = vector.shape_cast %111 : vector<1x8x64xf32> to vector<8x64xf32>
      %113 = vector.shape_cast %109 : vector<8x64xf32> to vector<1x8x64xf32>
      tpu.vector_store %arg11[%110, %c0_50, %c0_51], %113 {strides = array<i32>} : memref<2x8x64xf32, #tpu.memory_space<vmem>>, vector<1x8x64xf32>,
    }
    %c2_i32_2 = arith.constant 2 : i32
    %c0_3 = arith.constant 0 : index
    %c0_4 = arith.constant 0 : index
    %c0_5 = arith.constant 0 : index
    %13 = vector.load %arg11[%c0_3, %c0_4, %c0_5] : memref<2x8x64xf32, #tpu.memory_space<vmem>>, vector<1x8x64xf32>
    %14 = vector.shape_cast %13 : vector<1x8x64xf32> to vector<8x64xf32>
    %c0_6 = arith.constant 0 : index
    %c0_7 = arith.constant 0 : index
    %c0_8 = arith.constant 0 : index
    %15 = vector.load %arg10[%c0_6, %c0_7, %c0_8] : memref<1x8x128xf32, #tpu.memory_space<vmem>>, vector<1x8x64xf32>
    %16 = vector.shape_cast %15 : vector<1x8x64xf32> to vector<8x64xf32>
    %17 = vector.shape_cast %14 : vector<8x64xf32> to vector<1x8x64xf32>
    tpu.vector_store %arg10[%c0_6, %c0_7, %c0_8], %17 {strides = array<i32>} : memref<1x8x128xf32, #tpu.memory_space<vmem>>, vector<1x8x64xf32>,
    %c1 = arith.constant 1 : index
    %c0_9 = arith.constant 0 : index
    %c0_10 = arith.constant 0 : index
    %18 = vector.load %arg11[%c1, %c0_9, %c0_10] : memref<2x8x64xf32, #tpu.memory_space<vmem>>, vector<1x8x64xf32>
    %19 = vector.shape_cast %18 : vector<1x8x64xf32> to vector<8x64xf32>
    %c0_11 = arith.constant 0 : index
    %c0_12 = arith.constant 0 : index
    %c64 = arith.constant 64 : index
    %20 = vector.load %arg10[%c0_11, %c0_12, %c64] : memref<1x8x128xf32, #tpu.memory_space<vmem>>, vector<1x8x64xf32>
    %21 = vector.shape_cast %20 : vector<1x8x64xf32> to vector<8x64xf32>
    %22 = vector.shape_cast %19 : vector<8x64xf32> to vector<1x8x64xf32>
    tpu.vector_store %arg10[%c0_11, %c0_12, %c64], %22 {strides = array<i32>} : memref<1x8x128xf32, #tpu.memory_space<vmem>>, vector<1x8x64xf32>,
    return
  }
  func.func @transform_0(%arg0: i32, %arg1: i32, %arg2: memref<2xi32, #tpu.memory_space<smem>>, %arg3: memref<1xi32, #tpu.memory_space<smem>>) -> (i32, i32, i32, i32) {
    %c0_i32 = arith.constant 0 : i32
    %c0_i32_0 = arith.constant 0 : i32
    %c0_i32_1 = arith.constant 0 : i32
    return %arg0, %arg1, %c0_i32, %c0_i32_0 : i32, i32, i32, i32
  }
  func.func @transform_1(%arg0: i32, %arg1: i32, %arg2: memref<2xi32, #tpu.memory_space<smem>>, %arg3: memref<1xi32, #tpu.memory_space<smem>>) -> (i32, i32, i32, i32) {
    %c0_i32 = arith.constant 0 : i32
    %c0_i32_0 = arith.constant 0 : i32
    %c0_i32_1 = arith.constant 0 : i32
    return %arg0, %arg1, %c0_i32, %c0_i32_0 : i32, i32, i32, i32
  }
  func.func @transform_2(%arg0: i32, %arg1: i32, %arg2: memref<2xi32, #tpu.memory_space<smem>>, %arg3: memref<1xi32, #tpu.memory_space<smem>>) -> (i32, i32, i32, i32) {
    %c0_i32 = arith.constant 0 : i32
    %c0_i32_0 = arith.constant 0 : i32
    %c0_i32_1 = arith.constant 0 : i32
    return %arg0, %arg1, %c0_i32, %c0_i32_0 : i32, i32, i32, i32
  }
  func.func @transform_3(%arg0: i32, %arg1: i32, %arg2: memref<2xi32, #tpu.memory_space<smem>>, %arg3: memref<1xi32, #tpu.memory_space<smem>>) -> (i32, i32, i32) {
    %c0_i32 = arith.constant 0 : i32
    %c0_i32_0 = arith.constant 0 : i32
    %c0_i32_1 = arith.constant 0 : i32
    return %arg1, %c0_i32, %c0_i32_0 : i32, i32, i32
  }
  func.func @transform_4(%arg0: i32, %arg1: i32, %arg2: memref<2xi32, #tpu.memory_space<smem>>, %arg3: memref<1xi32, #tpu.memory_space<smem>>) -> (i32, i32, i32) {
    %c0_i32 = arith.constant 0 : i32
    %c0_i32_0 = arith.constant 0 : i32
    %c0_i32_1 = arith.constant 0 : i32
    return %arg1, %c0_i32, %c0_i32_0 : i32, i32, i32
  }
  func.func @transform_5(%arg0: i32, %arg1: i32, %arg2: memref<2xi32, #tpu.memory_space<smem>>, %arg3: memref<1xi32, #tpu.memory_space<smem>>) -> (i32, i32, i32) {
    %c0_i32 = arith.constant 0 : i32
    %c0_i32_0 = arith.constant 0 : i32
    %c0_i32_1 = arith.constant 0 : i32
    return %arg1, %c0_i32, %c0_i32_0 : i32, i32, i32
  }
  func.func @transform_6(%arg0: i32, %arg1: i32, %arg2: memref<2xi32, #tpu.memory_space<smem>>, %arg3: memref<1xi32, #tpu.memory_space<smem>>) -> (i32, i32, i32) {
    %c0_i32 = arith.constant 0 : i32
    %c0_i32_0 = arith.constant 0 : i32
    return %arg0, %c0_i32, %arg1 : i32, i32, i32
  }
}

module attributes {stable_mosaic.version = 11 : i64} {
  func.func @_matmul_kernel_single_k(%arg0: i32, %arg1: i32, %arg2: memref<16x256xf32, #tpu.memory_space<vmem>>, %arg3: memref<256x128xf32, #tpu.memory_space<vmem>>, %arg4: memref<16x128xf32, #tpu.memory_space<vmem>>) attributes {dimension_semantics = [#tpu.dimension_semantics<parallel>, #tpu.dimension_semantics<parallel>], iteration_bounds = array<i64: 1, 1>, scalar_prefetch = 0 : i64, scratch_operands = 0 : i64, tpu.core_type = #tpu.core_type<tc>, window_params = [{transform_indices = @transform_0, window_bounds = array<i64: 16, 256>}, {transform_indices = @transform_1, window_bounds = array<i64: 256, 128>}, {transform_indices = @transform_2, window_bounds = array<i64: 16, 128>}]} {
    %c0 = arith.constant 0 : index
    %c0_0 = arith.constant 0 : index
    %0 = vector.load %arg2[%c0, %c0_0] : memref<16x256xf32, #tpu.memory_space<vmem>>, vector<16x256xf32>
    %c0_1 = arith.constant 0 : index
    %c0_2 = arith.constant 0 : index
    %1 = vector.load %arg3[%c0_1, %c0_2] : memref<256x128xf32, #tpu.memory_space<vmem>>, vector<256x128xf32>
    %cst = arith.constant dense<0.000000e+00> : vector<16x128xf32>
    %2 = tpu.matmul %0, %1, %cst {dimension_numbers = #tpu.dot_dimension_numbers<[1], [0], [0], [1], [0, 0, 1, 1], [], []>} : vector<16x256xf32>, vector<256x128xf32>, vector<16x128xf32> -> vector<16x128xf32>
    %c0_3 = arith.constant 0 : index
    %c0_4 = arith.constant 0 : index
    %3 = vector.load %arg4[%c0_3, %c0_4] : memref<16x128xf32, #tpu.memory_space<vmem>>, vector<16x128xf32>
    tpu.vector_store %arg4[%c0_3, %c0_4], %2 {strides = array<i32>} : memref<16x128xf32, #tpu.memory_space<vmem>>, vector<16x128xf32>,
    return
  }
  func.func @transform_0(%arg0: i32, %arg1: i32) -> (i32, i32) {
    %c0_i32 = arith.constant 0 : i32
    %c0_i32_0 = arith.constant 0 : i32
    return %arg0, %c0_i32 : i32, i32
  }
  func.func @transform_1(%arg0: i32, %arg1: i32) -> (i32, i32) {
    %c0_i32 = arith.constant 0 : i32
    %c0_i32_0 = arith.constant 0 : i32
    return %c0_i32, %arg1 : i32, i32
  }
  func.func @transform_2(%arg0: i32, %arg1: i32) -> (i32, i32) {
    %c0_i32 = arith.constant 0 : i32
    return %arg0, %arg1 : i32, i32
  }
}

</mosaic_0001>

<bundles_post_ra>
// kernel: rel_pos_mha_forward.5
= control target key start
LH: loop header
LB: loop body
LE: loop exit
PB: predicated region body
PF: predicated region fallthrough
CT: control target
= control target key end

     0   :  { %vm29_vm0 = vcmask 523264   ;;  %s191_s1 = inlined_call_operand.vmem [shape: f32[64,256], index: 1, kind: input, shape index: {}]   ;;  %s192_s0 = inlined_call_operand.vmem [shape: f32[16,64], index: 0, kind: input, shape index: {}]   ;;  %s193_s2 = inlined_call_operand.vmem [shape: f32[16,256], index: 2, kind: output, shape index: {}]  }
   0x1   :  { %v27_v0 = vld [vmem:[%s191_s1 + $0x70] sm:$0xff]  ;;  %v28_v1 = vld [vmem:[%s191_s1 + $0x78] sm:$0xff]  ;;  %v25_v2 = vld [vmem:[%s191_s1 + $0x60] sm:$0xff] }
   0x2   :  { %94 = vmatpush.msra.mxu2 %v27_v0  ;;  %102 = vmatpush.msra.mxu3 %v28_v1  ;;  %v26_v3 = vld [vmem:[%s191_s1 + $0x68] sm:$0xff]  ;;  %v23_v4 = vld [vmem:[%s191_s1 + $0x50] sm:$0xff]  ;;  %v24_v5 = vld [vmem:[%s191_s1 + $0x58] sm:$0xff] }
   0x3   :  { %44 = vmatpush.msra.mxu0 %v27_v0  ;;  %67 = vmatpush.msra.mxu1 %v28_v1  ;;  %v21_v6 = vld [vmem:[%s191_s1 + $0x40] sm:$0xff]  ;;  %v22_v7 = vld [vmem:[%s191_s1 + $0x48] sm:$0xff]  ;;  %v19_v8 = vld [vmem:[%s191_s1 + $0x30] sm:$0xff] }
   0x4   :  { %95 = vmatpush.msra.mxu2 %v25_v2  ;;  %103 = vmatpush.msra.mxu3 %v26_v3  ;;  %v20_v9 = vld [vmem:[%s191_s1 + $0x38] sm:$0xff]  ;;  %v17_v10 = vld [vmem:[%s191_s1 + $0x20] sm:$0xff]  ;;  %v18_v11 = vld [vmem:[%s191_s1 + $0x28] sm:$0xff] }
   0x5   :  { %45 = vmatpush.msra.mxu0 %v25_v2  ;;  %68 = vmatpush.msra.mxu1 %v26_v3  ;;  %v15_v12 = vld [vmem:[%s191_s1 + $0x10] sm:$0xff]  ;;  %v16_v13 = vld [vmem:[%s191_s1 + $0x18] sm:$0xff]  ;;  %v13_v14 = vld [vmem:[%s191_s1] sm:$0xff] }
   0x6   :  { %96 = vmatpush.msra.mxu2 %v23_v4  ;;  %104 = vmatpush.msra.mxu3 %v24_v5  ;;  %v14_v15 = vld [vmem:[%s191_s1 + $0x8] sm:$0xff]  ;;  %v11_v17 = vld [vmem:[%s192_s0] sm:$0xff] }
   0x7   :  { %46 = vmatpush.msra.mxu0 %v23_v4  ;;  %69 = vmatpush.msra.mxu1 %v24_v5  ;;  %v12_v16 = vld [vmem:[%s192_s0 + $0x8] sm:$0xff] }
   0x8   :  { %97 = vmatpush.msra.mxu2 %v21_v6  ;;  %105 = vmatpush.msra.mxu3 %v22_v7 }
   0x9   :  { %47 = vmatpush.msra.mxu0 %v21_v6  ;;  %70 = vmatpush.msra.mxu1 %v22_v7 }
   0xa   :  { %98 = vmatpush.msra.mxu2 %v19_v8  ;;  %106 = vmatpush.msra.mxu3 %v20_v9 }
   0xb   :  { %48 = vmatpush.msra.mxu0 %v19_v8  ;;  %71 = vmatpush.msra.mxu1 %v20_v9 }
   0xc   :  { %99 = vmatpush.msra.mxu2 %v17_v10  ;;  %107 = vmatpush.msra.mxu3 %v18_v11 }
   0xd   :  { %49 = vmatpush.msra.mxu0 %v17_v10  ;;  %72 = vmatpush.msra.mxu1 %v18_v11 }
   0xe   :  { %100 = vmatpush.msra.mxu2 %v15_v12  ;;  %108 = vmatpush.msra.mxu3 %v16_v13 }
   0xf   :  { %50 = vmatpush.msra.mxu0 %v15_v12  ;;  %73 = vmatpush.msra.mxu1 %v16_v13 }
  0x10   :  { %101 = vmatpush.msra.mxu2 %v13_v14  ;;  %109 = vmatpush.msra.mxu3 %v14_v15 }
  0x11   :  { %91 = vmatmul.msk.f32.vlgmr.msra.gmra.mxu2 %vm29_vm0, %v12_v16  ;;  %93 = vmatmul.msk.f32.vlgmr.msra.gmra.mxu3 %vm29_vm0, %v12_v16 }
  0x12   :  { %51 = vmatpush.msra.mxu0 %v13_v14  ;;  %74 = vmatpush.msra.mxu1 %v14_v15 }
  0x13   :  { %90 = vmatmul.msk.f32.vlgmr.msra.gmra.mxu0 %vm29_vm0, %v11_v17  ;;  %92 = vmatmul.msk.f32.vlgmr.msra.gmra.mxu1 %vm29_vm0, %v11_v17 }
  0x90   :  { %v53_v18 = vpop.f32.mrf.mxu0  ;;  %v76_v19 = vpop.f32.mrf.mxu1 }
  0x91   :  { %82 = vst [vmem:[%s193_s2] sm:$0xff] %v53_v18 }
  0x92   :  { %83 = vst [vmem:[%s193_s2 + $0x8] sm:$0xff] %v76_v19 }
  0x94   :  { %v56_v20 = vpop.f32.mrf.mxu2  ;;  %v79_v21 = vpop.f32.mrf.mxu3 }
  0x95   :  { %84 = vst [vmem:[%s193_s2 + $0x10] sm:$0xff] %v56_v20 }
  0x96   :  { %85 = vst [vmem:[%s193_s2 + $0x18] sm:$0xff] %v79_v21 }

// kernel: rel_pos_mha_forward.6
= control target key start
LH: loop header
LB: loop body
LE: loop exit
PB: predicated region body
PF: predicated region fallthrough
CT: control target
= control target key end

     0   :  { %vm45_vm0 = vcmask 523264   ;;  %s313_s1 = inlined_call_operand.vmem [shape: f32[64,512], index: 1, kind: input, shape index: {}]   ;;  %s314_s0 = inlined_call_operand.vmem [shape: f32[16,64], index: 0, kind: input, shape index: {}]   ;;  %s315_s2 = inlined_call_operand.vmem [shape: f32[16,512], index: 2, kind: output, shape index: {}]  }
   0x1   :  { %v43_v0 = vld [vmem:[%s313_s1 + $0xf0] sm:$0xff]  ;;  %v44_v1 = vld [vmem:[%s313_s1 + $0xf8] sm:$0xff]  ;;  %v41_v6 = vld [vmem:[%s313_s1 + $0xe0] sm:$0xff] }
   0x2   :  { %v39_v2 = vld [vmem:[%s313_s1 + $0xd0] sm:$0xff]  ;;  %106 = vmatpush.msra.mxu2 %v43_v0  ;;  %129 = vmatpush.msra.mxu3 %v44_v1  ;;  %v40_v3 = vld [vmem:[%s313_s1 + $0xd8] sm:$0xff]  ;;  %v42_v7 = vld [vmem:[%s313_s1 + $0xe8] sm:$0xff] }
   0x3   :  { %v35_v4 = vld [vmem:[%s313_s1 + $0xb0] sm:$0xff]  ;;  %v36_v5 = vld [vmem:[%s313_s1 + $0xb8] sm:$0xff]  ;;  %v37_v8 = vld [vmem:[%s313_s1 + $0xc0] sm:$0xff]  ;;  %60 = vmatpush.msra.mxu0 %v41_v6  ;;  %83 = vmatpush.msra.mxu1 %v42_v7 }
   0x4   :  { %107 = vmatpush.msra.mxu2 %v39_v2  ;;  %130 = vmatpush.msra.mxu3 %v40_v3  ;;  %v38_v9 = vld [vmem:[%s313_s1 + $0xc8] sm:$0xff]  ;;  %v31_v10 = vld [vmem:[%s313_s1 + $0x90] sm:$0xff]  ;;  %v32_v11 = vld [vmem:[%s313_s1 + $0x98] sm:$0xff] }
   0x5   :  { %v33_v12 = vld [vmem:[%s313_s1 + $0xa0] sm:$0xff]  ;;  %v34_v13 = vld [vmem:[%s313_s1 + $0xa8] sm:$0xff]  ;;  %61 = vmatpush.msra.mxu0 %v37_v8  ;;  %84 = vmatpush.msra.mxu1 %v38_v9  ;;  %v27_v14 = vld [vmem:[%s313_s1 + $0x70] sm:$0xff] }
   0x6   :  { %108 = vmatpush.msra.mxu2 %v35_v4  ;;  %131 = vmatpush.msra.mxu3 %v36_v5  ;;  %v28_v15 = vld [vmem:[%s313_s1 + $0x78] sm:$0xff]  ;;  %v29_v16 = vld [vmem:[%s313_s1 + $0x80] sm:$0xff]  ;;  %v30_v17 = vld [vmem:[%s313_s1 + $0x88] sm:$0xff] }
   0x7   :  { %62 = vmatpush.msra.mxu0 %v33_v12  ;;  %85 = vmatpush.msra.mxu1 %v34_v13  ;;  %v23_v18 = vld [vmem:[%s313_s1 + $0x50] sm:$0xff]  ;;  %v24_v19 = vld [vmem:[%s313_s1 + $0x58] sm:$0xff]  ;;  %v25_v20 = vld [vmem:[%s313_s1 + $0x60] sm:$0xff] }
   0x8   :  { %109 = vmatpush.msra.mxu2 %v31_v10  ;;  %132 = vmatpush.msra.mxu3 %v32_v11  ;;  %v26_v21 = vld [vmem:[%s313_s1 + $0x68] sm:$0xff]  ;;  %v19_v22 = vld [vmem:[%s313_s1 + $0x30] sm:$0xff]  ;;  %v20_v23 = vld [vmem:[%s313_s1 + $0x38] sm:$0xff] }
   0x9   :  { %63 = vmatpush.msra.mxu0 %v29_v16  ;;  %86 = vmatpush.msra.mxu1 %v30_v17  ;;  %v21_v24 = vld [vmem:[%s313_s1 + $0x40] sm:$0xff]  ;;  %v22_v25 = vld [vmem:[%s313_s1 + $0x48] sm:$0xff]  ;;  %v15_v26 = vld [vmem:[%s313_s1 + $0x10] sm:$0xff] }
   0xa   :  { %110 = vmatpush.msra.mxu2 %v27_v14  ;;  %133 = vmatpush.msra.mxu3 %v28_v15  ;;  %v16_v27 = vld [vmem:[%s313_s1 + $0x18] sm:$0xff]  ;;  %v11_v28 = vld [vmem:[%s314_s0] sm:$0xff]  ;;  %v18_v30 = vld [vmem:[%s313_s1 + $0x28] sm:$0xff] }
   0xb   :  { %64 = vmatpush.msra.mxu0 %v25_v20  ;;  %87 = vmatpush.msra.mxu1 %v26_v21  ;;  %v17_v29 = vld [vmem:[%s313_s1 + $0x20] sm:$0xff]  ;;  %v14_v32 = vld [vmem:[%s313_s1 + $0x8] sm:$0xff] }
   0xc   :  { %111 = vmatpush.msra.mxu2 %v23_v18  ;;  %134 = vmatpush.msra.mxu3 %v24_v19  ;;  %v13_v31 = vld [vmem:[%s313_s1] sm:$0xff]  ;;  %v12_v33 = vld [vmem:[%s314_s0 + $0x8] sm:$0xff] }
   0xd   :  { %65 = vmatpush.msra.mxu0 %v21_v24  ;;  %88 = vmatpush.msra.mxu1 %v22_v25 }
   0xe   :  { %112 = vmatpush.msra.mxu2 %v19_v22  ;;  %135 = vmatpush.msra.mxu3 %v20_v23 }
   0xf   :  { %66 = vmatpush.msra.mxu0 %v17_v29  ;;  %89 = vmatpush.msra.mxu1 %v18_v30 }
  0x10   :  { %113 = vmatpush.msra.mxu2 %v15_v26  ;;  %136 = vmatpush.msra.mxu3 %v16_v27 }
  0x11   :  { %160 = vmatmul.msk.f32.vlgmr.msra.gmra.mxu2 %vm45_vm0, %v11_v28  ;;  %162 = vmatmul.msk.f32.vlgmr.msra.gmra.mxu3 %vm45_vm0, %v11_v28 }
  0x12   :  { %67 = vmatpush.msra.mxu0 %v13_v31  ;;  %90 = vmatpush.msra.mxu1 %v14_v32 }
  0x13   :  { %156 = vmatmul.msk.f32.vlgmr.msra.gmra.mxu0 %vm45_vm0, %v11_v28  ;;  %158 = vmatmul.msk.f32.vlgmr.msra.gmra.mxu1 %vm45_vm0, %v11_v28 }
  0x19   :  { %161 = vmatmul.msk.f32.gmra.mxu2 %vm45_vm0, %v12_v33  ;;  %163 = vmatmul.msk.f32.gmra.mxu3 %vm45_vm0, %v12_v33 }
  0x1b   :  { %157 = vmatmul.msk.f32.gmra.mxu0 %vm45_vm0, %v12_v33  ;;  %159 = vmatmul.msk.f32.gmra.mxu1 %vm45_vm0, %v12_v33 }
  0x90   :  { %v69_v34 = vpop.f32.mrf.mxu0  ;;  %v92_v35 = vpop.f32.mrf.mxu1 }
  0x91   :  { %144 = vst [vmem:[%s315_s2] sm:$0xff] %v69_v34 }
  0x92   :  { %145 = vst [vmem:[%s315_s2 + $0x8] sm:$0xff] %v92_v35 }
  0x94   :  { %v115_v36 = vpop.f32.mrf.mxu2  ;;  %v138_v37 = vpop.f32.mrf.mxu3 }
  0x95   :  { %146 = vst [vmem:[%s315_s2 + $0x10] sm:$0xff] %v115_v36 }
  0x96   :  { %147 = vst [vmem:[%s315_s2 + $0x18] sm:$0xff] %v138_v37 }
  0x98   :  { %v72_v38 = vpop.f32.mrf.mxu0  ;;  %v95_v39 = vpop.f32.mrf.mxu1 }
  0x99   :  { %148 = vst [vmem:[%s315_s2 + $0x20] sm:$0xff] %v72_v38 }
  0x9a   :  { %149 = vst [vmem:[%s315_s2 + $0x28] sm:$0xff] %v95_v39 }
  0x9c   :  { %v118_v40 = vpop.f32.mrf.mxu2  ;;  %v141_v41 = vpop.f32.mrf.mxu3 }
  0x9d   :  { %150 = vst [vmem:[%s315_s2 + $0x30] sm:$0xff] %v118_v40 }
  0x9e   :  { %151 = vst [vmem:[%s315_s2 + $0x38] sm:$0xff] %v141_v41 }

// kernel: rel_pos_mha_forward.7
= control target key start
LH: loop header
LB: loop body
LE: loop exit
PB: predicated region body
PF: predicated region fallthrough
CT: control target
= control target key end

     0   :  { %vm28_vm0 = vcmask 523264   ;;  %s152_s1 = inlined_call_operand.vmem [shape: f32[64,256], index: 1, kind: input, shape index: {}]   ;;  %s153_s0 = inlined_call_operand.vmem [shape: f32[8,64], index: 0, kind: input, shape index: {}]   ;;  %s154_s2 = inlined_call_operand.vmem [shape: f32[8,256], index: 2, kind: output, shape index: {}]  }
   0x1   :  { %v26_v0 = vld [vmem:[%s152_s1 + $0x70] sm:$0xff]  ;;  %v27_v1 = vld [vmem:[%s152_s1 + $0x78] sm:$0xff]  ;;  %v24_v2 = vld [vmem:[%s152_s1 + $0x60] sm:$0xff] }
   0x2   :  { %40 = vmatpush.msra.mxu0 %v26_v0  ;;  %60 = vmatpush.msra.mxu1 %v27_v1  ;;  %v25_v3 = vld [vmem:[%s152_s1 + $0x68] sm:$0xff]  ;;  %v22_v4 = vld [vmem:[%s152_s1 + $0x50] sm:$0xff]  ;;  %v23_v5 = vld [vmem:[%s152_s1 + $0x58] sm:$0xff] }
   0x3   :  { %v20_v6 = vld [vmem:[%s152_s1 + $0x40] sm:$0xff]  ;;  %v21_v7 = vld [vmem:[%s152_s1 + $0x48] sm:$0xff]  ;;  %v18_v8 = vld [vmem:[%s152_s1 + $0x30] sm:$0xff] }
   0x4   :  { %41 = vmatpush.msra.mxu0 %v24_v2  ;;  %61 = vmatpush.msra.mxu1 %v25_v3  ;;  %v19_v9 = vld [vmem:[%s152_s1 + $0x38] sm:$0xff]  ;;  %v16_v10 = vld [vmem:[%s152_s1 + $0x20] sm:$0xff]  ;;  %v17_v11 = vld [vmem:[%s152_s1 + $0x28] sm:$0xff] }
   0x5   :  { %v14_v12 = vld [vmem:[%s152_s1 + $0x10] sm:$0xff]  ;;  %v15_v13 = vld [vmem:[%s152_s1 + $0x18] sm:$0xff]  ;;  %v12_v14 = vld [vmem:[%s152_s1] sm:$0xff] }
   0x6   :  { %42 = vmatpush.msra.mxu0 %v22_v4  ;;  %62 = vmatpush.msra.mxu1 %v23_v5  ;;  %v13_v15 = vld [vmem:[%s152_s1 + $0x8] sm:$0xff]  ;;  %v11_v16 = vld [vmem:[%s153_s0] sm:$0xff] }
   0x8   :  { %43 = vmatpush.msra.mxu0 %v20_v6  ;;  %63 = vmatpush.msra.mxu1 %v21_v7 }
   0xa   :  { %44 = vmatpush.msra.mxu0 %v18_v8  ;;  %64 = vmatpush.msra.mxu1 %v19_v9 }
   0xc   :  { %45 = vmatpush.msra.mxu0 %v16_v10  ;;  %65 = vmatpush.msra.mxu1 %v17_v11 }
   0xe   :  { %46 = vmatpush.msra.mxu0 %v14_v12  ;;  %66 = vmatpush.msra.mxu1 %v15_v13 }
  0x10   :  { %47 = vmatpush.msra.mxu0 %v12_v14  ;;  %67 = vmatpush.msra.mxu1 %v13_v15 }
  0x11   :  { %78 = vmatmul.msk.f32.vlgmr.msra.gmra.mxu0 %vm28_vm0, %v11_v16  ;;  %79 = vmatmul.msk.f32.vlgmr.msra.gmra.mxu1 %vm28_vm0, %v11_v16 }
  0x8e   :  { %v49_v17 = vpop.f32.mrf.mxu0  ;;  %v69_v18 = vpop.f32.mrf.mxu1 }
  0x8f   :  { %72 = vst [vmem:[%s154_s2] sm:$0xff] %v49_v17 }
  0x90   :  { %73 = vst [vmem:[%s154_s2 + $0x8] sm:$0xff] %v69_v18 }

// kernel: rel_pos_mha_forward.9
= control target key start
LH: loop header
LB: loop body
LE: loop exit
PB: predicated region body
PF: predicated region fallthrough
CT: control target
= control target key end

     0   :  { %s260_s1 = inlined_call_operand.vmem [shape: f32[256,128], index: 1, kind: input, shape index: {}]   ;;  %s261_s0 = inlined_call_operand.vmem [shape: f32[16,256], index: 0, kind: input, shape index: {}]   ;;  %s262_s2 = inlined_call_operand.vmem [shape: f32[16,128], index: 2, kind: output, shape index: {}]  }
   0x1   :  { %v30_v0 = vld [vmem:[%s260_s1 + $0x78] sm:$0xff]  ;;  %v29_v2 = vld [vmem:[%s260_s1 + $0x70] sm:$0xff]  ;;  %v28_v4 = vld [vmem:[%s260_s1 + $0x68] sm:$0xff] }
   0x2   :  { %v46_v1 = vld [vmem:[%s260_s1 + $0xf8] sm:$0xff]  ;;  %99 = vmatpush.msra.mxu2 %v30_v0  ;;  %v45_v3 = vld [vmem:[%s260_s1 + $0xf0] sm:$0xff]  ;;  %v44_v5 = vld [vmem:[%s260_s1 + $0xe8] sm:$0xff]  ;;  %47 = vmatpush.msra.mxu0 %v30_v0 }
   0x3   :  { %115 = vmatpush.msra.mxu3 %v46_v1  ;;  %70 = vmatpush.msra.mxu1 %v46_v1  ;;  %v27_v6 = vld [vmem:[%s260_s1 + $0x60] sm:$0xff]  ;;  %v26_v8 = vld [vmem:[%s260_s1 + $0x58] sm:$0xff]  ;;  %v25_v10 = vld [vmem:[%s260_s1 + $0x50] sm:$0xff] }
   0x4   :  { %100 = vmatpush.msra.mxu2 %v29_v2  ;;  %v43_v7 = vld [vmem:[%s260_s1 + $0xe0] sm:$0xff]  ;;  %48 = vmatpush.msra.mxu0 %v29_v2  ;;  %v42_v9 = vld [vmem:[%s260_s1 + $0xd8] sm:$0xff]  ;;  %v41_v11 = vld [vmem:[%s260_s1 + $0xd0] sm:$0xff] }
   0x5   :  { %116 = vmatpush.msra.mxu3 %v45_v3  ;;  %71 = vmatpush.msra.mxu1 %v45_v3  ;;  %v24_v12 = vld [vmem:[%s260_s1 + $0x48] sm:$0xff]  ;;  %v23_v14 = vld [vmem:[%s260_s1 + $0x40] sm:$0xff]  ;;  %v22_v16 = vld [vmem:[%s260_s1 + $0x38] sm:$0xff] }
   0x6   :  { %101 = vmatpush.msra.mxu2 %v28_v4  ;;  %49 = vmatpush.msra.mxu0 %v28_v4  ;;  %v40_v13 = vld [vmem:[%s260_s1 + $0xc8] sm:$0xff]  ;;  %v39_v15 = vld [vmem:[%s260_s1 + $0xc0] sm:$0xff]  ;;  %v38_v17 = vld [vmem:[%s260_s1 + $0xb8] sm:$0xff] }
   0x7   :  { %117 = vmatpush.msra.mxu3 %v44_v5  ;;  %72 = vmatpush.msra.mxu1 %v44_v5  ;;  %v21_v18 = vld [vmem:[%s260_s1 + $0x30] sm:$0xff]  ;;  %v20_v20 = vld [vmem:[%s260_s1 + $0x28] sm:$0xff]  ;;  %v19_v22 = vld [vmem:[%s260_s1 + $0x20] sm:$0xff] }
   0x8   :  { %102 = vmatpush.msra.mxu2 %v27_v6  ;;  %50 = vmatpush.msra.mxu0 %v27_v6  ;;  %v37_v19 = vld [vmem:[%s260_s1 + $0xb0] sm:$0xff]  ;;  %v36_v21 = vld [vmem:[%s260_s1 + $0xa8] sm:$0xff]  ;;  %v35_v23 = vld [vmem:[%s260_s1 + $0xa0] sm:$0xff] }
   0x9   :  { %118 = vmatpush.msra.mxu3 %v43_v7  ;;  %73 = vmatpush.msra.mxu1 %v43_v7  ;;  %v18_v24 = vld [vmem:[%s260_s1 + $0x18] sm:$0xff]  ;;  %v17_v26 = vld [vmem:[%s260_s1 + $0x10] sm:$0xff]  ;;  %v16_v28 = vld [vmem:[%s260_s1 + $0x8] sm:$0xff] }
   0xa   :  { %103 = vmatpush.msra.mxu2 %v26_v8  ;;  %51 = vmatpush.msra.mxu0 %v26_v8  ;;  %v34_v25 = vld [vmem:[%s260_s1 + $0x98] sm:$0xff]  ;;  %v33_v27 = vld [vmem:[%s260_s1 + $0x90] sm:$0xff]  ;;  %v32_v29 = vld [vmem:[%s260_s1 + $0x88] sm:$0xff] }
   0xb   :  { %119 = vmatpush.msra.mxu3 %v42_v9  ;;  %74 = vmatpush.msra.mxu1 %v42_v9  ;;  %v15_v30 = vld [vmem:[%s260_s1] sm:$0xff]  ;;  %v13_v32 = vld [vmem:[%s261_s0 + $0x10] sm:$0xff]  ;;  %v14_v33 = vld [vmem:[%s261_s0 + $0x18] sm:$0xff] }
   0xc   :  { %104 = vmatpush.msra.mxu2 %v25_v10  ;;  %52 = vmatpush.msra.mxu0 %v25_v10  ;;  %v31_v31 = vld [vmem:[%s260_s1 + $0x80] sm:$0xff]  ;;  %v12_v35 = vld [vmem:[%s261_s0 + $0x8] sm:$0xff] }
   0xd   :  { %120 = vmatpush.msra.mxu3 %v41_v11  ;;  %75 = vmatpush.msra.mxu1 %v41_v11  ;;  %v11_v34 = vld [vmem:[%s261_s0] sm:$0xff] }
   0xe   :  { %105 = vmatpush.msra.mxu2 %v24_v12  ;;  %53 = vmatpush.msra.mxu0 %v24_v12 }
   0xf   :  { %121 = vmatpush.msra.mxu3 %v40_v13  ;;  %76 = vmatpush.msra.mxu1 %v40_v13 }
  0x10   :  { %106 = vmatpush.msra.mxu2 %v23_v14  ;;  %54 = vmatpush.msra.mxu0 %v23_v14 }
  0x11   :  { %122 = vmatpush.msra.mxu3 %v39_v15  ;;  %77 = vmatpush.msra.mxu1 %v39_v15 }
  0x12   :  { %107 = vmatpush.msra.mxu2 %v22_v16  ;;  %55 = vmatpush.msra.mxu0 %v22_v16 }
  0x13   :  { %123 = vmatpush.msra.mxu3 %v38_v17  ;;  %78 = vmatpush.msra.mxu1 %v38_v17 }
  0x14   :  { %108 = vmatpush.msra.mxu2 %v21_v18  ;;  %56 = vmatpush.msra.mxu0 %v21_v18 }
  0x15   :  { %124 = vmatpush.msra.mxu3 %v37_v19  ;;  %79 = vmatpush.msra.mxu1 %v37_v19 }
  0x16   :  { %109 = vmatpush.msra.mxu2 %v20_v20  ;;  %57 = vmatpush.msra.mxu0 %v20_v20 }
  0x17   :  { %125 = vmatpush.msra.mxu3 %v36_v21  ;;  %80 = vmatpush.msra.mxu1 %v36_v21 }
  0x18   :  { %110 = vmatpush.msra.mxu2 %v19_v22  ;;  %58 = vmatpush.msra.mxu0 %v19_v22 }
  0x19   :  { %126 = vmatpush.msra.mxu3 %v35_v23  ;;  %81 = vmatpush.msra.mxu1 %v35_v23 }
  0x1a   :  { %111 = vmatpush.msra.mxu2 %v18_v24  ;;  %59 = vmatpush.msra.mxu0 %v18_v24 }
  0x1b   :  { %127 = vmatpush.msra.mxu3 %v34_v25  ;;  %82 = vmatpush.msra.mxu1 %v34_v25 }
  0x1c   :  { %112 = vmatpush.msra.mxu2 %v17_v26  ;;  %60 = vmatpush.msra.mxu0 %v17_v26 }
  0x1d   :  { %128 = vmatpush.msra.mxu3 %v33_v27  ;;  %83 = vmatpush.msra.mxu1 %v33_v27 }
  0x1e   :  { %113 = vmatpush.msra.mxu2 %v16_v28  ;;  %61 = vmatpush.msra.mxu0 %v16_v28 }
  0x1f   :  { %129 = vmatpush.msra.mxu3 %v32_v29  ;;  %84 = vmatpush.msra.mxu1 %v32_v29 }
  0x20   :  { %114 = vmatpush.msra.mxu2 %v15_v30  ;;  %62 = vmatpush.msra.mxu0 %v15_v30 }
  0x21   :  { %130 = vmatpush.msra.mxu3 %v31_v31  ;;  %66 = vmatmul.f32.vlgmr.msra.gmra.mxu2 %v13_v32 }
  0x22   :  { %89 = vmatmul.f32.vlgmr.msra.gmra.mxu3 %v14_v33  ;;  %85 = vmatpush.msra.mxu1 %v31_v31 }
  0x23   :  { %63 = vmatmul.f32.vlgmr.msra.gmra.mxu0 %v11_v34  ;;  %86 = vmatmul.f32.vlgmr.msra.gmra.mxu1 %v12_v35 }
  0xa0   :  { %v64_v36 = vpop.f32.mrf.mxu0  ;;  %v87_v37 = vpop.f32.mrf.mxu1 }
  0xa1   :  { %v88_v38 = vadd.f32 %v87_v37, %v64_v36 }
  0xa3   :  { %93 = vst [vmem:[%s262_s2] sm:$0xff] %v88_v38 }
  0xa4   :  { %v67_v39 = vpop.f32.mrf.mxu2 }
  0xa5   :  { %v90_v40 = vpop.f32.mrf.mxu3 }
  0xa6   :  { %v91_v41 = vadd.f32 %v90_v40, %v67_v39 }
  0xa8   :  { %94 = vst [vmem:[%s262_s2 + $0x8] sm:$0xff] %v91_v41 }

// kernel: rel_pos_mha_forward.8
= control target key start
LH: loop header
LB: loop body
LE: loop exit
PB: predicated region body
PF: predicated region fallthrough
CT: control target
= control target key end

     0   :  { %s956_s10 = smov [#allocation4]   ;;  %s1168_s0 = inlined_call_operand.vmem [shape: s32[2], index: 0, kind: input, shape index: {}]   ;;  %s1169_s1 = inlined_call_operand.<no memory space> [shape: s32[1], index: 1, kind: input, shape index: {}]   ;;  %s1170_s2 = inlined_call_operand.vmem [shape: f32[2,4,8,64], index: 2, kind: input, shape index: {}]   ;;  %s1171_s3 = inlined_call_operand.vmem [shape: f32[2,4,8,64], index: 3, kind: input, shape index: {}]   ;;  %s1172_s4 = inlined_call_operand.vmem [shape: f32[2,4,8,64], index: 4, kind: input, shape index: {}]   ;;  %s1173_s5 = inlined_call_operand.vmem [shape: f32[4,8,64], index: 5, kind: input, shape index: {}]   ;;  %s1174_s6 = inlined_call_operand.vmem [shape: f32[4,1,64], index: 6, kind: input, shape index: {}]   ;;  %s1175_s7 = inlined_call_operand.vmem [shape: f32[4,1,64], index: 7, kind: input, shape index: {}]   ;;  %s1176_s8 = inlined_call_operand.vmem [shape: f32[2,8,256], index: 8, kind: output, shape index: {}]  }
   0x1   :  { %1177 = sst [smem:[#allocation9_spill]] %s1173_s5  ;;  %s14_s29 = sshll.u32 %s1168_s0, 4  ;;  %s15_s29 = int_to_ptr.vmem [resolvable:$true] %s14_s29 }
   0x2   :  { %18 = sst [smem:[#allocation5]] %s1169_s1 }
   0x3   :  { %17 = dma.vmem_to_smem %s15_s29, 16, %s956_s10, [#allocation3] }
   0x4   :  { %930 = dma.done.wait [#allocation3], 16 }
   0x5   :  { %931 = vsyncadd [#allocation3], 4294967280 }
   0x6   :  { %21 = sfence }
   0x7   :  { %s1014_s11 = smov 0   ;;  %s1016_s12 = smov 0  }
   0x8   :  { %s1018_s13 = smov 0   ;;  %s1020_s14 = smov 0  }
   0x9   :  { %s1022_s15 = smov 0  }
   0xa LB: > { %s36_s0 = sadd.s32 1, %s942_s13  ;;  %s39_s1 = sadd.s32 1, %s946_s14  ;;  %s950_s15 = sphi %s1022_s15, %s27_s15   ;;  %s946_s14 = sphi %s1020_s14, %s1187_s14   ;;  %s942_s13 = sphi %s1018_s13, %s1186_s13   ;;  %s938_s12 = sphi %s1016_s12, %s1185_s12   ;;  %s934_s11 = sphi %s1014_s11, %s1184_s11  }
   0xb   : > { %p37_p0 = scmp.ge.s32.totalorder %s36_s0, 2  ;;  %p809_p1 = scmp.ge.s32.totalorder %s950_s15, 1 }
   0xc   : > { %p309_p2 = scmp.lt.s32.totalorder %s950_s15, 5 }
   0xd   : > { %s1189_s0 = smov (%p37_p0, %s36_s0), 0  ;;  %s1191_s1 = smov (!%p37_p0, %s39_s1), %s946_s14 }
   0xe   : > { %1178 = sst [smem:[#allocation7_spill]] %s1189_s0  ;;  %p310_p3 = pnand %p809_p1, %p309_p2 }
   0xf   : > { %p41_p4 = scmp.ge.s32.totalorder %s1191_s1, 2  ;;  %s810_s16 = sshll.u32 (!%p310_p3), %s934_s11, 1 }
  0x10   : > { %313 = sbr.rel (%p310_p3) target bundleno = 1034 (0x40a), region = 44  ;;  %p378_p5 = scmp.lt.s32.totalorder (!%p310_p3), %s938_s12, 1 }
  0x11   : > { %s1193_s1 = smov (%p41_p4, %s1191_s1), 0  ;;  %p380_p6 = scmp.lt.s32.totalorder (!%p310_p3), %s810_s16, 3 }
  0x12   : > { %1179 = sst [smem:[#allocation8_spill]] %s1193_s1  ;;  %p425_p7 = scmp.lt.s32.totalorder (!%p310_p3), %s934_s11, 1 }
  0x13   : > { %s1180_s5 = sld [smem:[#allocation9_spill]] (!%p310_p3) }
  0x14   : > { %s436_s26 = sld [smem:[#allocation5]] (!%p310_p3) }
  0x15   : > { %s379_s17 = scalar_select %p378_p5, %s938_s12, 1  ;;  %v431_v0 = vlaneseq  ;;  %v957_v4 = vmov 0.0  }
  0x16   : > { %s1195_s16 = smov (!%p380_p6, %s810_s16), 3  ;;  %s1197_s11 = smov (!%p425_p7, %s934_s11), 1 }
  0x17   : > { %s811_s18 = sshll.u32 %s379_s17, 2  ;;  %s823_s19 = sshll.u32 %s379_s17, 1  ;;  %v432_v1 = vand.u32 127, %v431_v0 }
  0x18   : > { %s383_s20 = sadd.s32 %s811_s18, %s1195_s16  ;;  %s820_s21 = sshll.u32 %s1195_s16, 3 }
  0x19   : > { %s1056_s22 = sshll.u32 %s383_s20, 3  ;;  %s1061_s25 = scalar_lea.vmem %s1180_s5, %s820_s21 }
  0x1a   : > { %s385_s28 = scalar_lea.vmem %s1170_s2, %s1056_s22  ;;  %s405_s18 = scalar_lea.vmem %s1172_s4, %s1056_s22 }
  0x1b   : > { %s416_s23 = scalar_lea.vmem %s1174_s6, %s1195_s16  ;;  %s421_s21 = scalar_lea.vmem %s1175_s7, %s1195_s16 }
  0x1c   : > { %s433_s5 = sld [smem:[#allocation4 + %s938_s12]]  ;;  %s428_s27 = sadd.s32 %s823_s19, %s1197_s11 }
  0x1d   : > { %s824_s29 = sshll.u32 %s428_s27, 3  ;;  %p437_p8 = scmp.ne.s32.totalorder %s436_s26, 0 }
  0x1e   : > { %s1090_s10 = scalar_lea.vmem %s1176_s8, %s824_s29  ;;  %s1095_s11 = smov 0  }
  0x1f   : > { %s438_s1 = scalar_select %p437_p8, 1, 0 }
  0x21   : > { %v439_v3 = vstv %s438_s1 }
  0x22   : > { %v434_v2 = vstv %s433_s5  ;;  %vm440_vm1 = vcmp.eq.s32.totalorder %v439_v3, 1 }
  0x23   : > { %vm435_vm0 = vcmp.ge.s32.totalorder %v432_v1, %v434_v2 }
  0x24   : > { %vm441_vm2 = vmand %vm435_vm0, %vm440_vm1 }
  0x25   : > { %v1093_v5 = vsel %vm441_vm2, -10000.0, %v957_v4 }
  0x26 LB: >> { %s1101_s5 = sshll.u32 %s954_s11, 3  ;;  %vm470_vm3 = vcmask 523264   ;;  %s464_s19 = scalar_lea.vmem %s421_s21, %s954_s11  ;;  %vm500_vm4 = vcmask 1046528   ;;  %vm506_vm5 = vcmask 64512   ;;  %vm508_vm6 = vcmask 72704   ;;  %s954_s11 = sphi %s1095_s11, %s448_s11  }
  0x27   : >> { %s456_s9 = scalar_lea.vmem %s1061_s25, %s1101_s5  ;;  %s450_s24 = scalar_lea.vmem %s385_s28, %s1101_s5  ;;  %v888_v6 = vld [vmem:[%s464_s19] ss:$0 sm:$0xff]  ;;  %v511_v19 = vshrl.u32 %v431_v0, 7  ;;  %vm517_vm7 = vcmask 130048   ;;  %vm528_vm9 = vcmask 121856   ;;  %vm540_vm11 = vcmask 105472  }
  0x28   : >> { %v457_v7 = vld [vmem:[%s456_s9] sm:$0xff]  ;;  %s958_s26 = smov 9   ;;  %s458_s30 = scalar_lea.vmem %s416_s23, %s954_s11 }
  0x29   : >> { %v451_v8 = vld [vmem:[%s450_s24] sm:$0xff]  ;;  %826 = vmatpush.xpose.msk.msra.mxu0 %vm470_vm3, %v457_v7  ;;  %s959_s1 = smov 127   ;;  %s1181_s19 = scalar_lea.vmem %s1171_s3, %s1056_s22  ;;  %v512_v20 = vsub.s32 7, %v511_v19 }
  0x2a   : >> { %v469_v9 = vadd.f32 %v888_v6, %v451_v8  ;;  %s452_s9 = scalar_lea.vmem %s1181_s19, %s1101_s5  ;;  %v889_v17 = vld [vmem:[%s458_s30] ss:$0 sm:$0xff]  ;;  %s960_s17 = smov 126  }
  0x2b   : >> { %v453_v16 = vld [vmem:[%s452_s9] sm:$0xff]  ;;  %v463_v18 = vadd.f32 %v889_v17, %v451_v8  ;;  %v519_v21 = vand.u32 1, %v512_v20  ;;  %v530_v25 = vshra.s32 %v512_v20, 1  ;;  %s961_s20 = smov 124   ;;  %v542_v30 = vshra.s32 %v512_v20, 2  ;;  %s454_s27 = scalar_lea.vmem %s405_s18, %s1101_s5 }
  0x2c   : >> { %827 = vmatmul.msk.f32.vlgmr.msra.gmra.mxu0 %vm470_vm3, %v469_v9  ;;  %828 = vmatpush.xpose.msk.msra.mxu1 %vm470_vm3, %v453_v16  ;;  %v455_v40 = vld [vmem:[%s454_s27] sm:$0xff]  ;;  %s623_s29 = scalar_lea.vmem [#allocation2], %s1101_s5  ;;  %s448_s11 = sadd.s32 1, %s954_s11  }
  0x2d   : >> { %vm520_vm8 = vcmp.eq.s32.totalorder %v519_v21, 1  ;;  %v531_v26 = vand.u32 1, %v530_v25  ;;  %v543_v31 = vand.u32 1, %v542_v30  ;;  %603 = vmatpush.msra.mxu2 %v455_v40  ;;  %p445_p9 = scmp.ge.s32.totalorder %s448_s11, 2  }
  0x2e   : > { %s962_s30 = smov (%p445_p9), 64   ;;  %vm634_vm1 = vcmask (%p445_p9), 1048064  }
  0x2f   : >> { %829 = vmatmul.msk.f32.vlgmr.msra.gmra.mxu1 %vm470_vm3, %v463_v18  ;;  %vm532_vm10 = vcmp.eq.s32.totalorder %v531_v26, 1  ;;  %vm544_vm12 = vcmp.eq.s32.totalorder %v543_v31, 1 }
  0xa9   : >> { %v494_v10 = vpop.f32.mrf.mxu0 }
  0xaa   : >> { %v498_v11 = vrot.slane %v494_v10, 1  ;;  %v507_v13 = vsel %vm506_vm5, %v494_v10, 0.0 }
  0xac   : >> { %v501_v12 = vsel %vm500_vm4, %v498_v11, 0.0  ;;  %v571_v33 = vpop.f32.mrf.mxu1 }
  0xad   : >> { %503 = vrot.lane.b32.xlu0 %v501_v12, %s958_s26 }
 0x11f   : >> { %v504_v14 = vpop.permute.xlu0 %503 }
 0x120   : >> { %v509_v15 = vsel %vm508_vm6, %v507_v13, %v504_v14 }
 0x121   : >> { %514 = vrot.lane.b32.xlu0 %v509_v15, %s959_s1 }
 0x193   : >> { %v515_v22 = vpop.permute.xlu0 %514 }
 0x194   : >> { %v518_v23 = vsel %vm517_vm7, %v515_v22, 0.0 }
 0x195   : >> { %v523_v24 = vsel %vm520_vm8, %v518_v23, %v509_v15 }
 0x196   : >> { %525 = vrot.lane.b32.xlu1 %v523_v24, %s960_s17 }
 0x208   : >> { %v526_v27 = vpop.permute.xlu1 %525 }
 0x209   : >> { %v529_v28 = vsel %vm528_vm9, %v526_v27, 0.0 }
 0x20a   : >> { %v535_v29 = vsel %vm532_vm10, %v529_v28, %v523_v24 }
 0x20b   : >> { %537 = vrot.lane.b32.xlu1 %v535_v29, %s961_s20 }
 0x27d   : >> { %v538_v32 = vpop.permute.xlu1 %537 }
 0x27e   : >> { %v541_v34 = vsel %vm540_vm11, %v538_v32, 0.0 }
 0x27f   : >> { %v547_v35 = vsel %vm544_vm12, %v541_v34, %v535_v29 }
 0x280   : >> { %v572_v36 = vadd.f32 %v571_v33, %v547_v35 }
 0x282   : >> { %v574_v37 = vmul.f32 0.125, %v572_v36 }
 0x284   : >> { %v575_v38 = vadd.f32 %v574_v37, %v1093_v5 }
 0x286   : >> { %v576_v39 = vsel %vm506_vm5, %v575_v38, -inf }
 0x287   : >> { %577 = vmax.xlane.f32.xlu2 %v576_v39 }
 0x2fa   : >> { %v578_v41 = vpop.xlane.xlu2 %577 }
 0x2fb   : >> { %v579_v42 = vsub.f32 %v575_v38, %v578_v41 }
 0x2fd   : >> { %v580_v43 = vmul.f32 1.442695, %v579_v42 }
 0x2ff   : >> { %890 = vpow2.f32 %v580_v43 }
 0x305   : >> { %v891_v44 = vpop.eup %890 }
 0x306   : >> { %830 = vmatmul.msk.f32.vlgmr.msra.gmra.mxu2 %vm506_vm5, %v891_v44  ;;  %v582_v45 = vsel %vm506_vm5, %v891_v44, 0.0 }
 0x307   : >> { %583 = vadd.xlane.f32.xlu2 %v582_v45 }
 0x37a   : >> { %v584_v46 = vpop.xlane.xlu2 %583 }
 0x37b   : >> { %892 = vrcp.f32 %v584_v46  ;;  %v619_v50 = vand.u32 2147483648, %v584_v46  ;;  %v617_v52 = vand.u32 2147483647, %v584_v46  ;;  %vm613_vm14 = vweird.f32 %v584_v46 }
 0x37d   : >> { %v620_v54 = vor.u32 1.1754944e-38, %v619_v50  ;;  %vm618_vm0 = vcmp.eq.f32.partialorder %v617_v52, 8.507059e+37 }
 0x381   : >> { %v893_v47 = vpop.eup %892 }
 0x382   : >> { %v609_v48 = vmul.f32 %v893_v47, %v584_v46  ;;  %vm614_vm13 = vweird.f32 %v893_v47 }
 0x383   : >> { %vm615_vm15 = vmor %vm613_vm14, %vm614_vm13 }
 0x384   : >> { %v610_v49 = vsub.f32 1.0, %v609_v48 }
 0x386   : >> { %v611_v51 = vmul.f32 %v893_v47, %v610_v49 }
 0x388   : >> { %v612_v53 = vadd.f32 %v893_v47, %v611_v51 }
 0x389   : >> { %v605_v56 = vpop.f32.mrf.mxu2 }
 0x38a   : >> { %v616_v55 = vsel %vm615_vm15, %v893_v47, %v612_v53  ;;  %447 = sbr.rel (!%p445_p9) target bundleno = 38 (0x26), region = 104 }
 0x38b   : >> { %v621_v57 = vsel %vm618_vm0, %v620_v54, %v616_v55 }
 0x38c   : >> { %v622_v58 = vmul.f32 %v621_v57, %v605_v56 }
 0x38e   : >> { %624 = vst.msk [vmem:[%s623_s29] sm:$0xff] %vm470_vm3, %v622_v58 }
 0x395   : > { %v629_v59 = vld [vmem:[#allocation2 + $0x8] sm:$0xff]  ;;  %v625_v60 = vld [vmem:[#allocation2] sm:$0xff] }
 0x396   : > { %631 = vrot.lane.b32.xlu0 %v629_v59, %s962_s30  ;;  %627 = vst.msk [vmem:[%s1090_s10] sm:$0xff] %vm470_vm3, %v625_v60 }
 0x408   : > { %v632_v61 = vpop.permute.xlu0 %631 }
 0x409   : > { %635 = vst.msk [vmem:[%s1090_s10] sm:$0xff] %vm634_vm1, %v632_v61 }
 0x40a PF: > { %s27_s15 = sadd.s32 1, %s950_s15   ;;  %s1182_s5 = sld [smem:[#allocation7_spill]] }
 0x40b   : > { %p24_p10 = scmp.ge.s32.totalorder %s27_s15, 6   ;;  %s1183_s1 = sld [smem:[#allocation8_spill]] }
 0x40c   : > { %s1184_s11 = smov %s942_s13  ;;  %s1185_s12 = smov %s946_s14 }
 0x40d   :  { %26 = sbr.rel (!%p24_p10) target bundleno = 10 (0xa), region = 115 }
 0x410   : > { %s1186_s13 = smov %s1182_s5 }
 0x411   : > { %s1187_s14 = smov %s1183_s1 }

</bundles_post_ra>
